<compile_context>
chip_gen: v7x
topology: tpu7x:2x2x1
jax: 0.10.0
libtpu: 0.0.40
codegen_flags: <defaults>
</compile_context>

<pallas_src>
import functools
import math

import jax
import jax.numpy as jnp
import numpy as np
from jax.experimental import pallas as pl
from jax.experimental.pallas import tpu as pltpu


def _double_conv_kernel(x_ref, w1_ref, b1_ref, w2_ref, b2_ref, o_ref, *,
                        T, BHp, GPAD, PP):
    """One batch-of-B images per grid step; everything 2-D and lane-aligned."""
    # conv1 + ReLU: single MXU matmul.  x block rows are pre-lowered im2col
    # rows ordered (t, b, hp) with lanes (kh, w, ci); no in-kernel im2col.
    h1 = jnp.maximum(
        jnp.dot(x_ref[...], w1_ref[...], preferred_element_type=jnp.float32)
        + b1_ref[...], 0.0)                                   # (T*BHp, 128)

    # conv2: T accumulated matmuls.  Slice t selects the h1 rows whose conv1
    # output row is P*hp + t for every (b, hp) — contiguous, starts at
    # multiples of BHp (a multiple of 8), so no relayout.
    acc = jnp.dot(h1[0:BHp, :], w2_ref[0], preferred_element_type=jnp.float32)
    for t in range(1, T):
        acc = acc + jnp.dot(h1[t * BHp:(t + 1) * BHp, :], w2_ref[t],
                            preferred_element_type=jnp.float32)
    h2 = jnp.maximum(acc + b2_ref[...], 0.0)                  # (BHp, PP*GPAD)

    # PxP max-pool == max over the PP 128-lane column phase groups.
    pooled = h2[:, 0:GPAD]
    for q in range(1, PP):
        pooled = jnp.maximum(pooled, h2[:, q * GPAD:(q + 1) * GPAD])
    o_ref[...] = pooled.astype(o_ref.dtype)                   # (BHp, 128)


def double_conv_pallas(x_nchw, w1, b1, w2, b2, pool_kernel):
    """x_nchw: (N, Cin, H, W); w: (Cout, Cin, K, K) torch layout. Returns NCHW."""
    N, Cin, H, W = x_nchw.shape
    C1 = w1.shape[0]
    C2 = w2.shape[0]
    K = w1.shape[2]
    P = int(pool_kernel)
    H1, W1 = H - K + 1, W - K + 1
    H2, W2 = H1 - K + 1, W1 - K + 1
    Hp, Wp = H2 // P, W2 // P            # floor-mode pooling

    T = K + P - 1                        # conv1 row phases feeding one pooled row
    PP = P * P                           # pool-phase column groups
    KWC = K * W * Cin                    # conv1 contraction (lowered taps)
    D1 = W1 * C1                         # valid conv1 output lanes
    D1PAD = -(-D1 // 128) * 128          # conv1 lanes padded to a full vreg tile
    GV = Wp * C2                         # valid lanes per pool-phase group
    GPAD = -(-GV // 128) * 128           # phase group padded to a full vreg tile

    # ---- batching: B images per grid step ----
    # Target conv1 M ~= 128 rows, keep >= 2 grid steps when N >= 2 (v7x has two
    # TensorCores over the parallel axis), and keep B*Hp a multiple of 8 so all
    # block sublane dims satisfy the (8,128) rule and h1 slices stay aligned.
    row_align = 8 // math.gcd(Hp, 8)
    B = max(1, min(128 // (T * Hp), -(-N // 2)))
    B = max(row_align, (B // row_align) * row_align)
    G = -(-N // B)
    N_pad = G * B
    BHp = B * Hp

    xf = x_nchw.astype(jnp.float32)
    if N_pad != N:
        xf = jnp.concatenate(
            [xf, jnp.zeros((N_pad - N, Cin, H, W), jnp.float32)], axis=0)

    # ---- wrapper-side layout prep (pure gathers / weight lowering) ----
    # Image as (n, h, w*ci), channels fastest in the lane dim.
    x2d = jnp.transpose(xf, (0, 2, 3, 1)).reshape(N_pad, H, W * Cin)
    # Pre-lowered conv1 LHS: for each (t, hp) take conv1 input rows
    # P*hp + t + kh, kh = 0..K-1, concatenated along lanes.  Rows are then
    # regrouped to (g, t, b, hp) so every conv2 phase-t slice is contiguous.
    r1 = np.array([P * hp + t for t in range(T) for hp in range(Hp)], np.int32)
    x_low = jnp.concatenate([x2d[:, r1 + kh, :] for kh in range(K)], axis=-1)
    x_low = (x_low.reshape(G, B, T, Hp, KWC)
             .transpose(0, 2, 1, 3, 4)
             .reshape(G * T * BHp, KWC))                      # (G*T*B*Hp, KWC)

    # Lowered (Toeplitz) conv1 weights: rows (kh, w_in, ci), cols (w1, c1)
    # zero-padded from D1 to D1PAD lanes.
    w1_t = jnp.transpose(w1, (2, 3, 1, 0)).astype(jnp.float32)   # (kh,kw,ci,co)
    S1 = np.zeros((K, W, W1), np.float32)
    for kw in range(K):
        S1[kw, kw:kw + W1, :] = np.eye(W1, dtype=np.float32)
    w1_big = jnp.einsum('abcd,bef->aecfd', w1_t, S1).reshape(KWC, D1)
    w1_big = jnp.pad(w1_big, ((0, 0), (0, D1PAD - D1)))
    b1w = jnp.pad(jnp.tile(b1.astype(jnp.float32), W1),
                  (0, D1PAD - D1)).reshape(1, D1PAD)

    # Lowered conv2 weights, one slab per conv1-row phase t: rows (w1, c1)
    # padded to D1PAD; cols grouped by pool phase (jh, jw), within a group
    # (wp, co), each group padded to GPAD lanes.  Element:
    #   w2_big[t, (w1,c1), (jh,jw,wp,co)] = w2[co, c1, t-jh, w1-(P*wp+jw)]
    # when both kernel offsets are in range, else 0 (also drops floor-mode
    # leftover columns).
    w2_t = jnp.transpose(w2, (2, 3, 1, 0)).astype(jnp.float32)   # (kh,kw,c1,co)
    A = np.zeros((T, P, K), np.float32)
    for t in range(T):
        for jh in range(P):
            if 0 <= t - jh < K:
                A[t, jh, t - jh] = 1.0
    S2 = np.zeros((K, W1, P, Wp), np.float32)
    for kw in range(K):
        for jw in range(P):
            for wp in range(Wp):
                w_in = P * wp + jw + kw
                if w_in < W1:
                    S2[kw, w_in, jw, wp] = 1.0
    w2_big = jnp.einsum('thk,qwjp,kqcd->twchjpd', A, S2, w2_t)
    w2_big = w2_big.reshape(T, D1, PP, GV)
    w2_big = jnp.pad(w2_big, ((0, 0), (0, D1PAD - D1), (0, 0), (0, GPAD - GV)))
    w2_big = w2_big.reshape(T, D1PAD, PP * GPAD)
    b2w = jnp.tile(jnp.pad(jnp.tile(b2.astype(jnp.float32), Wp),
                           (0, GPAD - GV)), PP).reshape(1, PP * GPAD)

    kernel = functools.partial(_double_conv_kernel, T=T, BHp=BHp,
                               GPAD=GPAD, PP=PP)

    flops = 2 * G * (T * BHp * KWC * D1PAD + T * BHp * D1PAD * PP * GPAD)
    bytes_accessed = 4 * (x_low.size + w1_big.size + b1w.size + w2_big.size
                          + b2w.size + G * BHp * GPAD)

    out2d = pl.pallas_call(
        kernel,
        out_shape=jax.ShapeDtypeStruct((G * BHp, GPAD), x_nchw.dtype),
        grid_spec=pltpu.PrefetchScalarGridSpec(
            num_scalar_prefetch=0,
            grid=(G,),
            in_specs=[
                pl.BlockSpec((T * BHp, KWC), lambda g: (g, 0)),
                pl.BlockSpec((KWC, D1PAD), lambda g: (0, 0)),
                pl.BlockSpec((1, D1PAD), lambda g: (0, 0)),
                pl.BlockSpec((T, D1PAD, PP * GPAD), lambda g: (0, 0, 0)),
                pl.BlockSpec((1, PP * GPAD), lambda g: (0, 0)),
            ],
            out_specs=pl.BlockSpec((BHp, GPAD), lambda g: (g, 0)),
        ),
        compiler_params=pltpu.CompilerParams(dimension_semantics=("parallel",)),
        cost_estimate=pl.CostEstimate(flops=flops, transcendentals=0,
                                      bytes_accessed=bytes_accessed),
    )(x_low, w1_big, b1w, w2_big, b2w)

    # Drop padded lanes / padded images, restore NCHW.
    out = out2d.reshape(N_pad, Hp, GPAD)[:N, :, :GV].reshape(N, Hp, Wp, C2)
    return jnp.transpose(out, (0, 3, 1, 2))


def double_conv_reference(x, w1, b1, w2, b2, pool_kernel):
    """Plain-JAX reference matching the torch module (NCHW)."""
    def conv_relu(x, w, b):
        y = jax.lax.conv_general_dilated(
            x, w, window_strides=(1, 1), padding="VALID",
            dimension_numbers=("NCHW", "OIHW", "NCHW"))
        return jax.nn.relu(y + b[None, :, None, None])

    y = conv_relu(x, w1, b1)
    y = conv_relu(y, w2, b2)
    P = int(pool_kernel)
    y = jax.lax.reduce_window(y, -jnp.inf, jax.lax.max,
                              (1, 1, P, P), (1, 1, P, P), "VALID")
    return y


if __name__ == "__main__":
    # DoubleConv(channels=(4, 8, 8), kernel=3, pool_kernel=2)
    channels = (4, 8, 8)
    ksize = 3
    pool_kernel = 2
    N, H, W = 8, 16, 16          # N=8 -> B=4 images per step, grid=(2,)

    key = jax.random.PRNGKey(0)
    kx, kw1, kb1, kw2, kb2 = jax.random.split(key, 5)
    x = jax.random.normal(kx, (N, channels[0], H, W), dtype=jnp.float32)
    w1 = 0.1 * jax.random.normal(kw1, (channels[1], channels[0], ksize, ksize), jnp.float32)
    b1 = 0.1 * jax.random.normal(kb1, (channels[1],), jnp.float32)
    w2 = 0.1 * jax.random.normal(kw2, (channels[2], channels[1], ksize, ksize), jnp.float32)
    b2 = 0.1 * jax.random.normal(kb2, (channels[2],), jnp.float32)

    out = jax.block_until_ready(double_conv_pallas(x, w1, b1, w2, b2, pool_kernel))
    ref = jax.block_until_ready(double_conv_reference(x, w1, b1, w2, b2, pool_kernel))
    assert out.shape == ref.shape, (out.shape, ref.shape)
    np.testing.assert_allclose(np.asarray(out), np.asarray(ref), atol=1e-3, rtol=1e-3)

    print("KERNEL_OK")
</pallas_src>

<mosaic_0001>
module attributes {stable_mosaic.version = 11 : i64} {
  func.func @_double_conv_kernel(%arg0: i32, %arg1: memref<96x192xf32, #tpu.memory_space<vmem>>, %arg2: memref<192x128xf32, #tpu.memory_space<vmem>>, %arg3: memref<1x128xf32, #tpu.memory_space<vmem>>, %arg4: memref<4x128x512xf32, #tpu.memory_space<vmem>>, %arg5: memref<1x512xf32, #tpu.memory_space<vmem>>, %arg6: memref<24x128xf32, #tpu.memory_space<vmem>>) attributes {dimension_semantics = [#tpu.dimension_semantics<parallel>], iteration_bounds = array<i64: 2>, scalar_prefetch = 0 : i64, scratch_operands = 0 : i64, tpu.core_type = #tpu.core_type<tc>, window_params = [{transform_indices = @transform_0, window_bounds = array<i64: 96, 192>}, {pipeline_mode = #tpu.pipeline_mode<synchronous>, transform_indices = @transform_1, window_bounds = array<i64: 192, 128>}, {pipeline_mode = #tpu.pipeline_mode<synchronous>, transform_indices = @transform_2, window_bounds = array<i64: 1, 128>}, {pipeline_mode = #tpu.pipeline_mode<synchronous>, transform_indices = @transform_3, window_bounds = array<i64: 4, 128, 512>}, {pipeline_mode = #tpu.pipeline_mode<synchronous>, transform_indices = @transform_4, window_bounds = array<i64: 1, 512>}, {transform_indices = @transform_5, window_bounds = array<i64: 24, 128>}]} {
    %c0 = arith.constant 0 : index
    %c0_0 = arith.constant 0 : index
    %0 = vector.load %arg1[%c0, %c0_0] : memref<96x192xf32, #tpu.memory_space<vmem>>, vector<96x192xf32>
    %c0_1 = arith.constant 0 : index
    %c0_2 = arith.constant 0 : index
    %1 = vector.load %arg2[%c0_1, %c0_2] : memref<192x128xf32, #tpu.memory_space<vmem>>, vector<192x128xf32>
    %cst = arith.constant dense<0.000000e+00> : vector<96x128xf32>
    %2 = tpu.matmul %0, %1, %cst {dimension_numbers = #tpu.dot_dimension_numbers<[1], [0], [0], [1], [0, 0, 1, 1], [], []>} : vector<96x192xf32>, vector<192x128xf32>, vector<96x128xf32> -> vector<96x128xf32>
    %c0_3 = arith.constant 0 : index
    %c0_4 = arith.constant 0 : index
    %3 = vector.load %arg3[%c0_3, %c0_4] : memref<1x128xf32, #tpu.memory_space<vmem>>, vector<1x128xf32>
    %4 = vector.broadcast %3 : vector<1x128xf32> to vector<96x128xf32>
    %5 = arith.addf %2, %4 : vector<96x128xf32>
    %cst_5 = arith.constant 0.000000e+00 : f32
    %6 = vector.broadcast %cst_5 : f32 to vector<96x128xf32>
    %7 = arith.maximumf %5, %6 : vector<96x128xf32>
    %8 = vector.extract_strided_slice %7 {offsets = [0, 0], sizes = [24, 128], strides = [1, 1]} : vector<96x128xf32> to vector<24x128xf32>
    %c0_6 = arith.constant 0 : index
    %c0_7 = arith.constant 0 : index
    %c0_8 = arith.constant 0 : index
    %9 = vector.load %arg4[%c0_6, %c0_7, %c0_8] : memref<4x128x512xf32, #tpu.memory_space<vmem>>, vector<1x128x512xf32>
    %10 = vector.shape_cast %9 : vector<1x128x512xf32> to vector<128x512xf32>
    %cst_9 = arith.constant dense<0.000000e+00> : vector<24x512xf32>
    %11 = tpu.matmul %8, %10, %cst_9 {dimension_numbers = #tpu.dot_dimension_numbers<[1], [0], [0], [1], [0, 0, 1, 1], [], []>} : vector<24x128xf32>, vector<128x512xf32>, vector<24x512xf32> -> vector<24x512xf32>
    %12 = vector.extract_strided_slice %7 {offsets = [24, 0], sizes = [24, 128], strides = [1, 1]} : vector<96x128xf32> to vector<24x128xf32>
    %c1 = arith.constant 1 : index
    %c0_10 = arith.constant 0 : index
    %c0_11 = arith.constant 0 : index
    %13 = vector.load %arg4[%c1, %c0_10, %c0_11] : memref<4x128x512xf32, #tpu.memory_space<vmem>>, vector<1x128x512xf32>
    %14 = vector.shape_cast %13 : vector<1x128x512xf32> to vector<128x512xf32>
    %cst_12 = arith.constant dense<0.000000e+00> : vector<24x512xf32>
    %15 = tpu.matmul %12, %14, %cst_12 {dimension_numbers = #tpu.dot_dimension_numbers<[1], [0], [0], [1], [0, 0, 1, 1], [], []>} : vector<24x128xf32>, vector<128x512xf32>, vector<24x512xf32> -> vector<24x512xf32>
    %16 = arith.addf %11, %15 : vector<24x512xf32>
    %17 = vector.extract_strided_slice %7 {offsets = [48, 0], sizes = [24, 128], strides = [1, 1]} : vector<96x128xf32> to vector<24x128xf32>
    %c2 = arith.constant 2 : index
    %c0_13 = arith.constant 0 : index
    %c0_14 = arith.constant 0 : index
    %18 = vector.load %arg4[%c2, %c0_13, %c0_14] : memref<4x128x512xf32, #tpu.memory_space<vmem>>, vector<1x128x512xf32>
    %19 = vector.shape_cast %18 : vector<1x128x512xf32> to vector<128x512xf32>
    %cst_15 = arith.constant dense<0.000000e+00> : vector<24x512xf32>
    %20 = tpu.matmul %17, %19, %cst_15 {dimension_numbers = #tpu.dot_dimension_numbers<[1], [0], [0], [1], [0, 0, 1, 1], [], []>} : vector<24x128xf32>, vector<128x512xf32>, vector<24x512xf32> -> vector<24x512xf32>
    %21 = arith.addf %16, %20 : vector<24x512xf32>
    %22 = vector.extract_strided_slice %7 {offsets = [72, 0], sizes = [24, 128], strides = [1, 1]} : vector<96x128xf32> to vector<24x128xf32>
    %c3 = arith.constant 3 : index
    %c0_16 = arith.constant 0 : index
    %c0_17 = arith.constant 0 : index
    %23 = vector.load %arg4[%c3, %c0_16, %c0_17] : memref<4x128x512xf32, #tpu.memory_space<vmem>>, vector<1x128x512xf32>
    %24 = vector.shape_cast %23 : vector<1x128x512xf32> to vector<128x512xf32>
    %cst_18 = arith.constant dense<0.000000e+00> : vector<24x512xf32>
    %25 = tpu.matmul %22, %24, %cst_18 {dimension_numbers = #tpu.dot_dimension_numbers<[1], [0], [0], [1], [0, 0, 1, 1], [], []>} : vector<24x128xf32>, vector<128x512xf32>, vector<24x512xf32> -> vector<24x512xf32>
    %26 = arith.addf %21, %25 : vector<24x512xf32>
    %c0_19 = arith.constant 0 : index
    %c0_20 = arith.constant 0 : index
    %27 = vector.load %arg5[%c0_19, %c0_20] : memref<1x512xf32, #tpu.memory_space<vmem>>, vector<1x512xf32>
    %28 = vector.broadcast %27 : vector<1x512xf32> to vector<24x512xf32>
    %29 = arith.addf %26, %28 : vector<24x512xf32>
    %cst_21 = arith.constant 0.000000e+00 : f32
    %30 = vector.broadcast %cst_21 : f32 to vector<24x512xf32>
    %31 = arith.maximumf %29, %30 : vector<24x512xf32>
    %32 = vector.extract_strided_slice %31 {offsets = [0, 0], sizes = [24, 128], strides = [1, 1]} : vector<24x512xf32> to vector<24x128xf32>
    %33 = vector.extract_strided_slice %31 {offsets = [0, 128], sizes = [24, 128], strides = [1, 1]} : vector<24x512xf32> to vector<24x128xf32>
    %34 = arith.maximumf %32, %33 : vector<24x128xf32>
    %35 = vector.extract_strided_slice %31 {offsets = [0, 256], sizes = [24, 128], strides = [1, 1]} : vector<24x512xf32> to vector<24x128xf32>
    %36 = arith.maximumf %34, %35 : vector<24x128xf32>
    %37 = vector.extract_strided_slice %31 {offsets = [0, 384], sizes = [24, 128], strides = [1, 1]} : vector<24x512xf32> to vector<24x128xf32>
    %38 = arith.maximumf %36, %37 : vector<24x128xf32>
    %c0_22 = arith.constant 0 : index
    %c0_23 = arith.constant 0 : index
    %39 = vector.load %arg6[%c0_22, %c0_23] : memref<24x128xf32, #tpu.memory_space<vmem>>, vector<24x128xf32>
    tpu.vector_store %arg6[%c0_22, %c0_23], %38 {strides = array<i32>} : memref<24x128xf32, #tpu.memory_space<vmem>>, vector<24x128xf32>,
    return
  }
  func.func @transform_0(%arg0: i32) -> (i32, i32) {
    %c0_i32 = arith.constant 0 : i32
    %c0_i32_0 = arith.constant 0 : i32
    return %arg0, %c0_i32 : i32, i32
  }
  func.func @transform_1(%arg0: i32) -> (i32, i32) {
    %c0_i32 = arith.constant 0 : i32
    %c0_i32_0 = arith.constant 0 : i32
    %c0_i32_1 = arith.constant 0 : i32
    return %c0_i32, %c0_i32_0 : i32, i32
  }
  func.func @transform_2(%arg0: i32) -> (i32, i32) {
    %c0_i32 = arith.constant 0 : i32
    %c0_i32_0 = arith.constant 0 : i32
    %c0_i32_1 = arith.constant 0 : i32
    return %c0_i32, %c0_i32_0 : i32, i32
  }
  func.func @transform_3(%arg0: i32) -> (i32, i32, i32) {
    %c0_i32 = arith.constant 0 : i32
    %c0_i32_0 = arith.constant 0 : i32
    %c0_i32_1 = arith.constant 0 : i32
    %c0_i32_2 = arith.constant 0 : i32
    return %c0_i32, %c0_i32_0, %c0_i32_1 : i32, i32, i32
  }
  func.func @transform_4(%arg0: i32) -> (i32, i32) {
    %c0_i32 = arith.constant 0 : i32
    %c0_i32_0 = arith.constant 0 : i32
    %c0_i32_1 = arith.constant 0 : i32
    return %c0_i32, %c0_i32_0 : i32, i32
  }
  func.func @transform_5(%arg0: i32) -> (i32, i32) {
    %c0_i32 = arith.constant 0 : i32
    %c0_i32_0 = arith.constant 0 : i32
    return %arg0, %c0_i32 : i32, i32
  }
}

</mosaic_0001>

<bundles_post_ra>
// kernel: tpu_custom_call.1
= control target key start
LH: loop header
LB: loop body
LE: loop exit
PB: predicated region body
PF: predicated region fallthrough
CT: control target
= control target key end

     0   :  { %10 = vsyncpa [#allocation3], 0  ;;  %s2666_s0 = inlined_call_operand.hbm [shape: f32[192,192], index: 0, kind: input, shape index: {}]   ;;  %s2667_s1 = inlined_call_operand.hbm [shape: f32[192,128], index: 1, kind: input, shape index: {}]   ;;  %s2668_s2 = inlined_call_operand.vmem [shape: f32[1,128], index: 2, kind: input, shape index: {}]   ;;  %s2669_s3 = inlined_call_operand.hbm [shape: f32[4,128,512], index: 3, kind: input, shape index: {}]   ;;  %s2670_s4 = inlined_call_operand.vmem [shape: f32[1,512], index: 4, kind: input, shape index: {}]   ;;  %s2671_s5 = inlined_call_operand.hbm [shape: f32[48,128], index: 5, kind: output, shape index: {}]  }
   0x1   :  { %12 = vsyncpa [#allocation3 + $0x1], 0 }
   0x2   :  { %13 = vsyncpa [#allocation6], 0 }
   0x3   :  { %14 = vsyncpa [#allocation4], 0 }
   0x4   :  { %16 = vsyncpa [#allocation4 + $0x1], 0  ;;  %s2255_s18 = smov 0   ;;  %s2257_s19 = smov 0  }
   0x5   :  { %s2259_s20 = smov 0   ;;  %s2261_s21 = smov 0  }
   0x6 LB: > { %s2276_s22 = sadd.s32 4294967295, %s2209_s21   ;;  %s1615_s23 = sadd.s32 4294967294, %s2209_s21   ;;  %s2209_s21 = sphi %s2261_s21, %s2691_s21   ;;  %s2205_s20 = sphi %s2259_s20, %s2690_s20   ;;  %s2201_s19 = sphi %s2257_s19, %s2689_s19   ;;  %s2197_s18 = sphi %s2255_s18, %s2688_s18  }
   0x7   : > { %p42_p0 = scmp.ne.s32.totalorder %s2201_s19, %s2197_s18  ;;  %p2672_p1 = scmp.eq.s32.totalorder %s2276_s22, 0 }
   0x8   : > { %p156_p3 = scmp.eq.s32.totalorder %s1615_s23, 1  ;;  %p1616_p5 = scmp.ge.s32.totalorder %s2209_s21, 1 }
   0x9   : > { %p2285_p4 = por %p2672_p1, %p42_p0  ;;  %p163_p7 = scmp.lt.s32.totalorder %s2209_s21, 3 }
   0xa   : > { %p2290_p6 = por %p156_p3, %p42_p0  ;;  %s2211_s27 = smov [#allocation5]  }
   0xb   : > { %s2675_s24 = scalar_select %p2285_p4, 1, 0 }
   0xc   : > { %s2676_s25 = scalar_select %p2290_p6, 1, 0 }
   0xd   : > { %p2295_p8 = pnand %p1616_p5, %p163_p7  ;;  %s175_s28 = sshll.u32 %s2211_s27, 4  ;;  %s2299_s28 = int_to_ptr.vmem [resolvable:$true] %s175_s28 }
   0xe   : > { %s2212_s30 = smov [#allocation7]   ;;  %s2053_s9 = scalar_lea.hbm %s2667_s1, 3072 }
   0xf   : > { %p1988_p9 = pneg %p2295_p8  ;;  %s191_s6 = sshll.u32 %s2212_s30, 4  ;;  %s2310_s6 = int_to_ptr.vmem [resolvable:$true] %s191_s6 }
  0x10   : > { %p2054_p12 = scmp.ne.s32.totalorder %s2667_s1, %s2053_s9  ;;  %p2060_p5 = scmp.lt.u32.totalorder %s2053_s9, %s2667_s1 }
  0x11   : > { %p2306_p11 = pnand %p1988_p9, %p2672_p1 }
  0x13   : > { %p2055_p13 = pneg %p2306_p11 }
  0x15   : > { %p2056_p0 = pnand %p2055_p13, %p2054_p12 }
  0x17   : > { %p2057_p3 = pneg %p2056_p0 }
  0x19   : > { %p2062_p7 = pnand %p2060_p5, %p2057_p3 }
  0x1b   : > { %2065 = shalt.err (!%p2062_p7)
}
  0x1c   : > { %s2066_s14 = scalar_lea.vmem %s2299_s28, 3072  ;;  %p2074_p2 = scmp.lt.s32.totalorder %s2299_s28, %s2299_s28 }
  0x1d   : > { %p2067_p9 = scmp.ne.s32.totalorder %s2299_s28, %s2066_s14  ;;  %p2075_p12 = scmp.lt.s32.totalorder %s2066_s14, %s2066_s14 }
  0x1f   : > { %p2069_p10 = pnand %p2067_p9, %p2055_p13  ;;  %p2076_p0 = por %p2075_p12, %p2074_p2 }
  0x21   : > { %p2070_p1 = pneg %p2069_p10 }
  0x23   : > { %p2077_p6 = pnand %p2076_p0, %p2070_p1 }
  0x25   : > { %2080 = shalt.err (!%p2077_p6)
}
  0x26   : > { %s2213_s15 = smov 128   ;;  %s2214_s16 = smov 8  }
  0x27   : > { %1991 = dma.hbm_to_vmem [thread:$0]  (!%p2306_p11), %s2667_s1, 3072, %s2299_s28, [#allocation6], %s2213_s15, %s2213_s15, %s2214_s16  }
  0x28   : > { %s2081_s7 = scalar_lea.hbm %s2669_s3, 32768 }
  0x29   : > { %p2082_p2 = scmp.ne.s32.totalorder %s2669_s3, %s2081_s7  ;;  %p2088_p10 = scmp.lt.u32.totalorder %s2081_s7, %s2669_s3 }
  0x2b   : > { %p2084_p1 = pnand %p2082_p2, %p2055_p13 }
  0x2d   : > { %p2085_p6 = pneg %p2084_p1 }
  0x2f   : > { %p2090_p3 = pnand %p2088_p10, %p2085_p6 }
  0x31   : > { %2093 = shalt.err (!%p2090_p3)
}
  0x32   : > { %s2094_s28 = scalar_lea.vmem %s2310_s6, 32768  ;;  %p2102_p12 = scmp.lt.s32.totalorder %s2310_s6, %s2310_s6 }
  0x33   : > { %p2095_p5 = scmp.ne.s32.totalorder %s2310_s6, %s2094_s28  ;;  %p2103_p0 = scmp.lt.s32.totalorder %s2094_s28, %s2094_s28 }
  0x35   : > { %p2097_p7 = pnand %p2095_p5, %p2055_p13  ;;  %p2104_p2 = por %p2103_p0, %p2102_p12 }
  0x37   : > { %p2098_p9 = pneg %p2097_p7 }
  0x39   : > { %p2105_p1 = pnand %p2104_p2, %p2098_p9 }
  0x3b   : > { %2108 = shalt.err (!%p2105_p1)
}
  0x3c   : > { %s2215_s12 = smov 512   ;;  %s2216_s13 = smov 32  }
  0x3d   : > { %1994 = dma.hbm_to_vmem [thread:$0]  (!%p2306_p11), %s2669_s3, 32768, %s2310_s6, [#allocation6], %s2215_s12, %s2215_s12, %s2216_s13  }
  0x3e   : > { %s2365_s16 = sadd.s32 1, %s2209_s21   ;;  %s29_s23 = sadd.s32 1, %s2205_s20 }
  0x3f   : > { %s26_s17 = ssub.s32 %s2209_s21, %s2365_s16  ;;  %p36_p6 = scmp.ne.s32.totalorder %s2205_s20, %s2201_s19 }
  0x40   : > { %p27_p13 = scmp.eq.s32.totalorder %s26_s17, 0  ;;  %p37_p10 = scmp.eq.s32.totalorder %s2209_s21, 0 }
  0x41   : > { %p2679_p5 = scmp.eq.s32.totalorder %s2276_s22, 1  ;;  %p2005_p9 = scmp.lt.s32.totalorder %s2209_s21, 2 }
  0x42   : > { %s2374_s27 = scalar_select %p27_p13, %s2205_s20, %s29_s23  }
  0x43   : > { %p38_p3 = por %p37_p10, %p36_p6  ;;  %p2378_p7 = por %p2679_p5, %p36_p6 }
  0x44   : > { %s208_s29 = sand.u32 1, %s2205_s20   ;;  %s1644_s6 = smul.u32 3072, %s2209_s21 }
  0x45   : > { %s2680_s30 = scalar_select %p2378_p7, 1, 0 }
  0x46   : > { %s1973_s7 = smul.u32 192, %s208_s29  ;;  %p2385_p11 = pnand %p2005_p9, %p38_p3 }
  0x47   : > { %s2392_s11 = scalar_lea.hbm %s2666_s0, %s1644_s6  ;;  %s2396_s13 = scalar_lea.sflag [#allocation3], %s208_s29 }
  0x48   : > { %s212_s28 = scalar_lea.vmem [#allocation2], %s1973_s7  ;;  %s2109_s14 = scalar_lea.hbm %s2392_s11, 3072 }
  0x49   : > { %s220_s12 = sshll.u32 %s212_s28, 4  ;;  %p2110_p12 = scmp.ne.s32.totalorder %s2392_s11, %s2109_s14  ;;  %s2394_s12 = int_to_ptr.vmem [resolvable:$true] %s220_s12 }
  0x4a   : > { %p2111_p0 = pneg %p2385_p11  ;;  %s2114_s23 = scalar_lea.hbm %s2666_s0, 6144 }
  0x4b   : > { %p2115_p13 = scmp.lt.u32.totalorder %s2392_s11, %s2666_s0  ;;  %p2116_p6 = scmp.lt.u32.totalorder %s2114_s23, %s2109_s14 }
  0x4c   : > { %p2112_p2 = pnand %p2111_p0, %p2110_p12  ;;  %p2118_p3 = scmp.lt.u32.totalorder %s2109_s14, %s2392_s11 }
  0x4d   : > { %p2117_p10 = por %p2116_p6, %p2115_p13 }
  0x4e   : > { %p2113_p1 = pneg %p2112_p2 }
  0x4f   : > { %p2119_p5 = por %p2118_p3, %p2117_p10 }
  0x51   : > { %p2120_p9 = pnand %p2119_p5, %p2113_p1 }
  0x53   : > { %2123 = shalt.err (!%p2120_p9)
}
  0x54   : > { %s2124_s29 = scalar_lea.vmem %s2394_s12, 3072  ;;  %s2217_s7 = smov [#allocation2]  }
  0x55   : > { %p2125_p12 = scmp.ne.s32.totalorder %s2394_s12, %s2124_s29  ;;  %s2129_s10 = sshll.u32 %s2217_s7, 4  ;;  %s2130_s10 = int_to_ptr.vmem [resolvable:$false] %s2129_s10 }
  0x56   : > { %s2131_s28 = scalar_lea.vmem %s2130_s10, 6144  ;;  %p2132_p4 = scmp.lt.s32.totalorder %s2394_s12, %s2130_s10 }
  0x57   : > { %p2127_p2 = pnand %p2125_p12, %p2111_p0  ;;  %p2133_p13 = scmp.lt.s32.totalorder %s2131_s28, %s2124_s29 }
  0x59   : > { %p2128_p7 = pneg %p2127_p2  ;;  %p2134_p6 = por %p2133_p13, %p2132_p4 }
  0x5b   : > { %p2135_p10 = pnand %p2134_p6, %p2128_p7 }
  0x5d   : > { %2138 = shalt.err (!%p2135_p10)
}
  0x5e   : > { %s2218_s14 = smov 256   ;;  %s2219_s15 = smov 16  }
  0x5f   : > { %1998 = dma.hbm_to_vmem [thread:$0]  (!%p2385_p11), %s2392_s11, 3072, %s2394_s12, %s2396_s13, %s2218_s14, %s2218_s14, %s2219_s15  }
  0x60   : > { %232 = sbr.rel (%p2295_p8) target bundleno = 746 (0x2ea), region = 40  ;;  %s2427_s17 = sand.u32 (!%p2295_p8), 1, %s2201_s19  }
  0x61   : > { %s1974_s23 = smul.u32 (!%p2295_p8), 192, %s2427_s17  ;;  %s235_s6 = scalar_lea.sflag (!%p2295_p8), [#allocation3], %s2427_s17 }
  0x62   : > { %p2682_p4 = scmp.ne.s32.totalorder (!%p2295_p8), %s2675_s24, 0 }
  0x63   : > { %s2431_s9 = scalar_lea.vmem (!%p2295_p8), [#allocation2], %s1974_s23 }
  0x67   : > { %2184 = dma.done.wait (%p2682_p4), %s235_s6, 3072  }
  0x68   : > { %2186 = vsyncadd (%p2682_p4), %s235_s6, 4294964224  ;;  %p2683_p7 = scmp.eq.s32.totalorder %s2276_s22, 0 }
  0x6a   : > { %2188 = dma.done.wait (%p2683_p7), [#allocation6], 35840   ;;  %p2684_p8 = pmov %p2683_p7 }
  0x6b   : > { %v2220_v0 = vmov 0.0|0.0   ;;  %v299_v1 = vld [vmem:[#allocation5] sm:$0xff]  ;;  %v300_v2 = vld [vmem:[#allocation5 + $0x8] sm:$0xff]  ;;  %v301_v3 = vld [vmem:[#allocation5 + $0x10] sm:$0xff]  ;;  %vm330_vm0 = vcmask 523264   ;;  %s1975_s12 = smul.u32 24, %s2427_s17 }
  0x6c   : > { %2190 = vsyncadd (%p2684_p8), [#allocation6], 4294931456  ;;  %1645 = vmatprep.subr.bf16.mxu0 %v2220_v0  ;;  %v1646_v4 = vpack.c.bf16 %v300_v2, %v299_v1  ;;  %v302_v5 = vld [vmem:[#allocation5 + $0x18] sm:$0xff]  ;;  %v303_v7 = vld [vmem:[#allocation5 + $0x20] sm:$0xff]  ;;  %s1643_s7 = smul.u32 384, %s2276_s22  ;;  %s1510_s15 = scalar_lea.sflag [#allocation4], %s2427_s17 }
  0x6d   : > { %v1649_v6 = vpack.c.bf16 %v302_v5, %v301_v3  ;;  %v304_v8 = vld [vmem:[#allocation5 + $0x28] sm:$0xff]  ;;  %v305_v10 = vld [vmem:[#allocation5 + $0x30] sm:$0xff]  ;;  %v306_v11 = vld [vmem:[#allocation5 + $0x38] sm:$0xff]  ;;  %s272_s13 = scalar_lea.vmem [#allocation8], %s1975_s12  ;;  %p2685_p0 = scmp.ne.s32.totalorder %s2680_s30, 0 }
  0x6e   : > { %1647 = vmatpush1.bf16.msra.mxu0 %v1646_v4  ;;  %v1652_v9 = vpack.c.bf16 %v304_v8, %v303_v7  ;;  %v276_v12 = vld [vmem:[%s2431_s9 + $0x8] sm:$0xff]  ;;  %v1655_v13 = vpack.c.bf16 %v306_v11, %v305_v10  ;;  %v307_v14 = vld [vmem:[#allocation5 + $0x40] sm:$0xff]  ;;  %v309_v17 = vld [vmem:[#allocation5 + $0x50] sm:$0xff]  ;;  %s1523_s29 = sshll.u32 %s272_s13, 4  ;;  %s2622_s14 = scalar_lea.hbm %s2671_s5, %s1643_s7  ;;  %s2617_s29 = int_to_ptr.vmem [resolvable:$true] %s1523_s29 }
  0x6f   : > { %1648 = vmatprep.subr.bf16.mxu0 %v2220_v0  ;;  %1626 = vmatprep.mubr.msk.f32.mxu0 %vm330_vm0, %v276_v12  ;;  %v308_v15 = vld [vmem:[#allocation5 + $0x48] sm:$0xff]  ;;  %v310_v18 = vld [vmem:[#allocation5 + $0x58] sm:$0xff]  ;;  %v506_v21 = vld [vmem:[#allocation7 + $0x10] sm:$0xff]  ;;  %s2139_s23 = scalar_lea.vmem %s2617_s29, 384  ;;  %s2222_s22 = smov [#allocation8]  }
  0x70   : > { %v1658_v16 = vpack.c.bf16 %v308_v15, %v307_v14  ;;  %v507_v19 = vld [vmem:[#allocation7 + $0x18] sm:$0xff]  ;;  %v510_v23 = vld [vmem:[#allocation7 + $0x30] sm:$0xff]  ;;  %v1661_v31 = vpack.c.bf16 %v310_v18, %v309_v17  ;;  %v311_v33 = vld [vmem:[#allocation5 + $0x60] sm:$0xff]  ;;  %p2140_p11 = scmp.ne.s32.totalorder %s2617_s29, %s2139_s23  ;;  %s2143_s6 = sshll.u32 %s2222_s22, 4  ;;  %s2144_s6 = int_to_ptr.vmem [resolvable:$false] %s2143_s6 }
  0x71   : > { %v511_v20 = vld [vmem:[#allocation7 + $0x38] sm:$0xff]  ;;  %v1779_v26 = vpack.c.bf16 %v510_v23, %v506_v21  ;;  %v514_v28 = vld [vmem:[#allocation7 + $0x50] sm:$0xff]  ;;  %v312_v34 = vld [vmem:[#allocation5 + $0x68] sm:$0xff]  ;;  %p2146_p5 = scmp.lt.s32.totalorder %s2617_s29, %s2144_s6 }
  0x72   : > { %1650 = vmatpush1.bf16.msra.mxu0 %v1649_v6  ;;  %v1777_v22 = vpack.c.bf16 %v511_v20, %v507_v19  ;;  %v515_v24 = vld [vmem:[#allocation7 + $0x58] sm:$0xff]  ;;  %v518_v29 = vld [vmem:[#allocation7 + $0x70] sm:$0xff]  ;;  %v1664_v41 = vpack.c.bf16 %v312_v34, %v311_v33  ;;  %v315_v51 = vld [vmem:[#allocation5 + $0x80] sm:$0xff]  ;;  %p2141_p1 = pnand %p2140_p11, %p2685_p0 }
  0x73   : > { %1651 = vmatprep.subr.bf16.mxu0 %v2220_v0  ;;  %v519_v25 = vld [vmem:[#allocation7 + $0x78] sm:$0xff]  ;;  %v1783_v35 = vpack.c.bf16 %v518_v29, %v514_v28  ;;  %v522_v37 = vld [vmem:[#allocation7 + $0x90] sm:$0xff]  ;;  %v316_v52 = vld [vmem:[#allocation5 + $0x88] sm:$0xff] }
  0x74   : > { %v1781_v27 = vpack.c.bf16 %v519_v25, %v515_v24  ;;  %v523_v30 = vld [vmem:[#allocation7 + $0x98] sm:$0xff]  ;;  %1778 = vmatprep.subr.bf16.mxu1 %v1777_v22  ;;  %v526_v38 = vld [vmem:[#allocation7 + $0xb0] sm:$0xff]  ;;  %v1670_v59 = vpack.c.bf16 %v316_v52, %v315_v51  ;;  %v319_v6 = vld [vmem:[#allocation5 + $0xa0] sm:$0xff]  ;;  %p2142_p3 = pneg %p2141_p1 }
  0x75   : > { %v527_v32 = vld [vmem:[#allocation7 + $0xb8] sm:$0xff]  ;;  %1780 = vmatpush1.bf16.msra.mxu1 %v1779_v26  ;;  %v313_v42 = vld [vmem:[#allocation5 + $0x70] sm:$0xff]  ;;  %v1787_v44 = vpack.c.bf16 %v526_v38, %v522_v37  ;;  %v320_v7 = vld [vmem:[#allocation5 + $0xa8] sm:$0xff] }
  0x76   : > { %1653 = vmatpush1.bf16.msra.mxu0 %v1652_v9  ;;  %1782 = vmatprep.subr.bf16.mxu1 %v1781_v27  ;;  %v1785_v36 = vpack.c.bf16 %v527_v32, %v523_v30  ;;  %v531_v39 = vld [vmem:[#allocation7 + $0xd8] sm:$0xff]  ;;  %v530_v46 = vld [vmem:[#allocation7 + $0xd0] sm:$0xff]  ;;  %v1676_v12 = vpack.c.bf16 %v320_v7, %v319_v6  ;;  %v574_v17 = vld [vmem:[#allocation7 + $0x228] sm:$0xff] }
  0x77   : > { %1654 = vmatprep.subr.bf16.mxu0 %v2220_v0  ;;  %v535_v40 = vld [vmem:[#allocation7 + $0xf8] sm:$0xff]  ;;  %v534_v47 = vld [vmem:[#allocation7 + $0xf0] sm:$0xff]  ;;  %v569_v20 = vld [vmem:[#allocation7 + $0x200] sm:$0xff] }
  0x78   : > { %v314_v43 = vld [vmem:[#allocation5 + $0x78] sm:$0xff]  ;;  %v1789_v45 = vpack.c.bf16 %v535_v40, %v531_v39  ;;  %v1791_v53 = vpack.c.bf16 %v534_v47, %v530_v46  ;;  %v538_v55 = vld [vmem:[#allocation7 + $0x110] sm:$0xff]  ;;  %v573_v21 = vld [vmem:[#allocation7 + $0x220] sm:$0xff] }
  0x79   : > { %1784 = vmatpush1.bf16.msra.mxu1 %v1783_v35  ;;  %v539_v48 = vld [vmem:[#allocation7 + $0x118] sm:$0xff]  ;;  %v1667_v50 = vpack.c.bf16 %v314_v43, %v313_v42  ;;  %v542_v56 = vld [vmem:[#allocation7 + $0x130] sm:$0xff]  ;;  %v578_v22 = vld [vmem:[#allocation7 + $0x248] sm:$0xff]  ;;  %v1683_v25 = vpack.c.bf16 %v573_v21, %v569_v20  ;;  %v2221_v21 = vmov 0.0  }
  0x7a   : > { %1656 = vmatpush1.bf16.msra.mxu0 %v1655_v13  ;;  %1786 = vmatprep.subr.bf16.mxu1 %v1785_v36  ;;  %v543_v49 = vld [vmem:[#allocation7 + $0x138] sm:$0xff]  ;;  %v317_v60 = vld [vmem:[#allocation5 + $0x90] sm:$0xff]  ;;  %v1795_v62 = vpack.c.bf16 %v542_v56, %v538_v55  ;;  %v582_v23 = vld [vmem:[#allocation7 + $0x268] sm:$0xff] }
  0x7b   : > { %1657 = vmatprep.subr.bf16.mxu0 %v2220_v0  ;;  %v1793_v54 = vpack.c.bf16 %v543_v49, %v539_v48  ;;  %v547_v57 = vld [vmem:[#allocation7 + $0x158] sm:$0xff]  ;;  %v546_v1 = vld [vmem:[#allocation7 + $0x150] sm:$0xff]  ;;  %v275_v24 = vld [vmem:[%s2431_s9] sm:$0xff]  ;;  %v1685_v27 = vpack.c.bf16 %v582_v23, %v578_v22  ;;  %946 = vmatprep.mubr.f32.mxu1 %v2221_v21 }
  0x7c   : > { %v551_v58 = vld [vmem:[#allocation7 + $0x178] sm:$0xff]  ;;  %v550_v2 = vld [vmem:[#allocation7 + $0x170] sm:$0xff]  ;;  %v577_v28 = vld [vmem:[#allocation7 + $0x240] sm:$0xff] }
  0x7d   : > { %1788 = vmatpush1.bf16.msra.mxu1 %v1787_v44  ;;  %v318_v61 = vld [vmem:[#allocation5 + $0x98] sm:$0xff]  ;;  %v1797_v63 = vpack.c.bf16 %v551_v58, %v547_v57  ;;  %v1799_v8 = vpack.c.bf16 %v550_v2, %v546_v1  ;;  %v554_v10 = vld [vmem:[#allocation7 + $0x190] sm:$0xff]  ;;  %v581_v29 = vld [vmem:[#allocation7 + $0x260] sm:$0xff] }
  0x7e   : > { %1659 = vmatpush1.bf16.msra.mxu0 %v1658_v16  ;;  %1790 = vmatprep.subr.bf16.mxu1 %v1789_v45  ;;  %v555_v3 = vld [vmem:[#allocation7 + $0x198] sm:$0xff]  ;;  %v1673_v5 = vpack.c.bf16 %v318_v61, %v317_v60  ;;  %v558_v11 = vld [vmem:[#allocation7 + $0x1b0] sm:$0xff]  ;;  %v570_v16 = vld [vmem:[#allocation7 + $0x208] sm:$0xff]  ;;  %v1687_v32 = vpack.c.bf16 %v581_v29, %v577_v28 }
  0x7f   : > { %1660 = vmatprep.subr.bf16.mxu0 %v2220_v0  ;;  %v559_v4 = vld [vmem:[#allocation7 + $0x1b8] sm:$0xff]  ;;  %v321_v13 = vld [vmem:[#allocation5 + $0xb0] sm:$0xff]  ;;  %v1803_v15 = vpack.c.bf16 %v558_v11, %v554_v10  ;;  %v1681_v19 = vpack.c.bf16 %v574_v17, %v570_v16  ;;  %v586_v30 = vld [vmem:[#allocation7 + $0x288] sm:$0xff] }
  0x80   : > { %v1801_v9 = vpack.c.bf16 %v559_v4, %v555_v3  ;;  %v322_v14 = vld [vmem:[#allocation5 + $0xb8] sm:$0xff]  ;;  %v280_v33 = vld [vmem:[%s2431_s9 + $0x28] sm:$0xff]  ;;  %v585_v35 = vld [vmem:[#allocation7 + $0x280] sm:$0xff] }
  0x81   : > { %1792 = vmatpush1.bf16.msra.mxu1 %v1791_v53  ;;  %v1679_v18 = vpack.c.bf16 %v322_v14, %v321_v13  ;;  %v278_v26 = vld [vmem:[%s2431_s9 + $0x18] sm:$0xff]  ;;  %v589_v36 = vld [vmem:[#allocation7 + $0x2a0] sm:$0xff]  ;;  %v594_v37 = vld [vmem:[#allocation7 + $0x2c8] sm:$0xff] }
  0x82   : > { %1662 = vmatpush1.bf16.msra.mxu0 %v1661_v31  ;;  %1794 = vmatprep.subr.bf16.mxu1 %v1793_v54  ;;  %v590_v31 = vld [vmem:[#allocation7 + $0x2a8] sm:$0xff]  ;;  %v279_v39 = vld [vmem:[%s2431_s9 + $0x20] sm:$0xff]  ;;  %v1691_v40 = vpack.c.bf16 %v589_v36, %v585_v35  ;;  %v281_v45 = vld [vmem:[%s2431_s9 + $0x30] sm:$0xff] }
  0x83   : > { %1663 = vmatprep.subr.bf16.mxu0 %v2220_v0  ;;  %v1689_v34 = vpack.c.bf16 %v590_v31, %v586_v30  ;;  %v598_v38 = vld [vmem:[#allocation7 + $0x2e8] sm:$0xff]  ;;  %v593_v43 = vld [vmem:[#allocation7 + $0x2c0] sm:$0xff]  ;;  %v286_v49 = vld [vmem:[%s2431_s9 + $0x58] sm:$0xff] }
  0x84   : > { %v1693_v42 = vpack.c.bf16 %v598_v38, %v594_v37  ;;  %v597_v44 = vld [vmem:[#allocation7 + $0x2e0] sm:$0xff]  ;;  %v284_v47 = vld [vmem:[%s2431_s9 + $0x48] sm:$0xff]  ;;  %v290_v53 = vld [vmem:[%s2431_s9 + $0x78] sm:$0xff] }
  0x85   : > { %1796 = vmatpush1.bf16.msra.mxu1 %v1795_v62  ;;  %v1695_v46 = vpack.c.bf16 %v597_v44, %v593_v43  ;;  %v283_v48 = vld [vmem:[%s2431_s9 + $0x40] sm:$0xff]  ;;  %v288_v51 = vld [vmem:[%s2431_s9 + $0x68] sm:$0xff]  ;;  %v289_v54 = vld [vmem:[%s2431_s9 + $0x70] sm:$0xff] }
  0x86   : > { %1665 = vmatpush1.bf16.msra.mxu0 %v1664_v41  ;;  %1798 = vmatprep.subr.bf16.mxu1 %v1797_v63  ;;  %v282_v41 = vld [vmem:[%s2431_s9 + $0x38] sm:$0xff]  ;;  %v287_v52 = vld [vmem:[%s2431_s9 + $0x60] sm:$0xff]  ;;  %v292_v55 = vld [vmem:[%s2431_s9 + $0x88] sm:$0xff] }
  0x87   : > { %1666 = vmatprep.subr.bf16.mxu0 %v2220_v0  ;;  %v291_v56 = vld [vmem:[%s2431_s9 + $0x80] sm:$0xff]  ;;  %v294_v57 = vld [vmem:[%s2431_s9 + $0x98] sm:$0xff]  ;;  %v293_v58 = vld [vmem:[%s2431_s9 + $0x90] sm:$0xff] }
  0x88   : > { %v295_v60 = vld [vmem:[%s2431_s9 + $0xa0] sm:$0xff]  ;;  %v298_v61 = vld [vmem:[%s2431_s9 + $0xb8] sm:$0xff]  ;;  %v297_v62 = vld [vmem:[%s2431_s9 + $0xb0] sm:$0xff] }
  0x89   : > { %1800 = vmatpush1.bf16.msra.mxu1 %v1799_v8  ;;  %v602_v63 = vld [vmem:[#allocation7 + $0x308] sm:$0xff]  ;;  %v563_v2 = vld [vmem:[#allocation7 + $0x1d8] sm:$0xff]  ;;  %v605_v6 = vld [vmem:[#allocation7 + $0x320] sm:$0xff] }
  0x8a   : > { %1668 = vmatpush1.bf16.msra.mxu0 %v1667_v50  ;;  %1802 = vmatprep.subr.bf16.mxu1 %v1801_v9  ;;  %v285_v50 = vld [vmem:[%s2431_s9 + $0x50] sm:$0xff]  ;;  %v606_v1 = vld [vmem:[#allocation7 + $0x328] sm:$0xff]  ;;  %v567_v4 = vld [vmem:[#allocation7 + $0x1f8] sm:$0xff] }
  0x8b   : > { %1669 = vmatprep.subr.bf16.mxu0 %v2220_v0  ;;  %v1697_v3 = vpack.c.bf16 %v606_v1, %v602_v63  ;;  %v1805_v7 = vpack.c.bf16 %v567_v4, %v563_v2  ;;  %v562_v9 = vld [vmem:[#allocation7 + $0x1d0] sm:$0xff]  ;;  %v614_v13 = vld [vmem:[#allocation7 + $0x368] sm:$0xff]  ;;  %v609_v17 = vld [vmem:[#allocation7 + $0x340] sm:$0xff] }
  0x8c   : > { %v566_v10 = vld [vmem:[#allocation7 + $0x1f0] sm:$0xff]  ;;  %v967_v14 = vld [vmem:[#allocation7 + $0x408] sm:$0xff]  ;;  %v625_v31 = vld [vmem:[#allocation7 + $0x3c0] sm:$0xff] }
  0x8d   : > { %1804 = vmatpush1.bf16.msra.mxu1 %v1803_v15  ;;  %v1807_v11 = vpack.c.bf16 %v566_v10, %v562_v9  ;;  %v971_v16 = vld [vmem:[#allocation7 + $0x428] sm:$0xff]  ;;  %v2494_v36 = vld [vmem:[%s2668_s2] ss:$0 sm:$0xff]  ;;  %v571_v2 = vld [vmem:[#allocation7 + $0x210] sm:$0xff] }
  0x8e   : > { %1671 = vmatpush1.bf16.msra.mxu0 %v1670_v59  ;;  %v296_v59 = vld [vmem:[%s2431_s9 + $0xa8] sm:$0xff]  ;;  %1806 = vmatprep.subr.bf16.mxu1 %v1805_v7  ;;  %v966_v37 = vld [vmem:[#allocation7 + $0x400] sm:$0xff]  ;;  %v584_v10 = vld [vmem:[#allocation7 + $0x278] sm:$0xff] }
  0x8f   : > { %1672 = vmatprep.subr.bf16.mxu0 %v2220_v0  ;;  %v618_v22 = vld [vmem:[#allocation7 + $0x388] sm:$0xff]  ;;  %v970_v38 = vld [vmem:[#allocation7 + $0x420] sm:$0xff] }
  0x90   : > { %v622_v23 = vld [vmem:[#allocation7 + $0x3a8] sm:$0xff]  ;;  %v1811_v44 = vpack.c.bf16 %v970_v38, %v966_v37  ;;  %v994_v7 = vld [vmem:[#allocation7 + $0x4e0] sm:$0xff] }
  0x91   : > { %1808 = vmatpush1.bf16.msra.mxu1 %v1807_v11  ;;  %v626_v28 = vld [vmem:[#allocation7 + $0x3c8] sm:$0xff] }
  0x92   : > { %1674 = vmatpush1.bf16.msra.mxu0 %v1673_v5  ;;  %v601_v5 = vld [vmem:[#allocation7 + $0x300] sm:$0xff]  ;;  %v630_v29 = vld [vmem:[#allocation7 + $0x3e8] sm:$0xff] }
  0x93   : > { %1675 = vmatprep.subr.bf16.mxu0 %v2220_v0  ;;  %v1699_v8 = vpack.c.bf16 %v605_v6, %v601_v5  ;;  %v1709_v30 = vpack.c.bf16 %v630_v29, %v626_v28  ;;  %v990_v6 = vld [vmem:[#allocation7 + $0x4c0] sm:$0xff]  ;;  %v999_v11 = vld [vmem:[#allocation7 + $0x508] sm:$0xff] }
  0x94   : > { %v1007_v28 = vld [vmem:[#allocation7 + $0x548] sm:$0xff] }
  0x95   : > { %v1011_v29 = vld [vmem:[#allocation7 + $0x568] sm:$0xff] }
  0x96   : > { %1677 = vmatpush1.bf16.msra.mxu0 %v1676_v12  ;;  %v610_v12 = vld [vmem:[#allocation7 + $0x348] sm:$0xff]  ;;  %v1829_v38 = vpack.c.bf16 %v1011_v29, %v1007_v28 }
  0x97   : > { %1678 = vmatprep.subr.bf16.mxu0 %v2220_v0  ;;  %v277_v0 = vld [vmem:[%s2431_s9 + $0x10] sm:$0xff]  ;;  %v1701_v15 = vpack.c.bf16 %v614_v13, %v610_v12  ;;  %v1003_v12 = vld [vmem:[#allocation7 + $0x528] sm:$0xff]  ;;  %s2145_s9 = scalar_lea.vmem %s2144_s6, 768 }
  0x98   : > { %p2147_p9 = scmp.lt.s32.totalorder %s2145_s9, %s2139_s23 }
  0x9a   : > { %1680 = vmatpush1.bf16.msra.mxu0 %v1679_v18  ;;  %v613_v18 = vld [vmem:[#allocation7 + $0x360] sm:$0xff]  ;;  %p2148_p12 = por %p2147_p9, %p2146_p5 }
  0x9b   : > { %1682 = vmatprep.subr.bf16.mxu0 %v1681_v19  ;;  %v1809_v19 = vpack.c.bf16 %v971_v16, %v967_v14  ;;  %v1703_v20 = vpack.c.bf16 %v613_v18, %v609_v17  ;;  %v1823_v16 = vpack.c.bf16 %v994_v7, %v990_v6  ;;  %v579_v17 = vld [vmem:[#allocation7 + $0x250] sm:$0xff] }
  0x9c   : > { %v583_v18 = vld [vmem:[#allocation7 + $0x270] sm:$0xff]  ;;  %p2149_p2 = pnand %p2148_p12, %p2142_p3 }
  0x9d   : > { %432 = vmatmul.mubr.f32.vlgmr.msra.gmra.mrb[0].mxu0 %v275_v24  ;;  %1810 = vmatprep.subr.bf16.mxu1 %v1809_v19  ;;  %v1705_v24 = vpack.c.bf16 %v622_v23, %v618_v22  ;;  %v1825_v22 = vpack.c.bf16 %v1003_v12, %v999_v11  ;;  %v998_v23 = vld [vmem:[#allocation7 + $0x500] sm:$0xff] }
  0x9e   : > { %1627 = vmatprep.mubr.msk.f32.mxu0 %vm330_vm0, %v278_v26  ;;  %1684 = vmatpush1.bf16.msra.mxu0 %v1683_v25  ;;  %v617_v25 = vld [vmem:[#allocation7 + $0x380] sm:$0xff] }
  0x9f   : > { %1686 = vmatprep.subr.bf16.mxu0 %v1685_v27  ;;  %v621_v26 = vld [vmem:[#allocation7 + $0x3a0] sm:$0xff] }
  0xa0   : > { %v1707_v27 = vpack.c.bf16 %v621_v26, %v617_v25  ;;  %v588_v25 = vld [vmem:[#allocation7 + $0x298] sm:$0xff]  ;;  %v1022_v12 = vld [vmem:[#allocation7 + $0x5c0] sm:$0xff] }
  0xa1   : > { %437 = vmatmul.mubr.f32.gmra.mrb[2].mxu0 %v277_v0  ;;  %v629_v0 = vld [vmem:[#allocation7 + $0x3e0] sm:$0xff] }
  0xa2   : > { %1628 = vmatprep.mubr.msk.f32.mxu0 %vm330_vm0, %v280_v33  ;;  %1688 = vmatpush1.bf16.msra.mxu0 %v1687_v32  ;;  %v1711_v32 = vpack.c.bf16 %v629_v0, %v625_v31  ;;  %v572_v33 = vld [vmem:[#allocation7 + $0x218] sm:$0xff]  ;;  %v1719_v0 = vpack.c.bf16 %v583_v18, %v579_v17 }
  0xa3   : > { %1690 = vmatprep.subr.bf16.mxu0 %v1689_v34  ;;  %v576_v34 = vld [vmem:[#allocation7 + $0x238] sm:$0xff] }
  0xa4   : > { %v1713_v35 = vpack.c.bf16 %v576_v34, %v572_v33  ;;  %v587_v33 = vld [vmem:[#allocation7 + $0x290] sm:$0xff]  ;;  %v969_v17 = vld [vmem:[#allocation7 + $0x418] sm:$0xff] }
  0xa5   : > { %442 = vmatmul.mubr.f32.gmra.mrb[4].mxu0 %v279_v39  ;;  %v591_v34 = vld [vmem:[#allocation7 + $0x2b0] sm:$0xff]  ;;  %v973_v18 = vld [vmem:[#allocation7 + $0x438] sm:$0xff] }
  0xa6   : > { %1629 = vmatprep.mubr.msk.f32.mxu0 %vm330_vm0, %v282_v41  ;;  %1692 = vmatpush1.bf16.msra.mxu0 %v1691_v40  ;;  %v975_v40 = vld [vmem:[#allocation7 + $0x448] sm:$0xff]  ;;  %v1841_v29 = vpack.c.bf16 %v973_v18, %v969_v17 }
  0xa7   : > { %1694 = vmatprep.subr.bf16.mxu0 %v1693_v42  ;;  %v979_v41 = vld [vmem:[#allocation7 + $0x468] sm:$0xff] }
  0xa9   : > { %447 = vmatmul.mubr.f32.gmra.mrb[6].mxu0 %v281_v45 }
  0xaa   : > { %1630 = vmatprep.mubr.msk.f32.mxu0 %vm330_vm0, %v284_v47  ;;  %1696 = vmatpush1.bf16.msra.mxu0 %v1695_v46  ;;  %v1813_v46 = vpack.c.bf16 %v979_v41, %v975_v40  ;;  %v974_v47 = vld [vmem:[#allocation7 + $0x440] sm:$0xff]  ;;  %v596_v41 = vld [vmem:[#allocation7 + $0x2d8] sm:$0xff] }
  0xab   : > { %1698 = vmatprep.subr.bf16.mxu0 %v1697_v3  ;;  %v575_v3 = vld [vmem:[#allocation7 + $0x230] sm:$0xff]  ;;  %v1010_v40 = vld [vmem:[#allocation7 + $0x560] sm:$0xff] }
  0xad   : > { %452 = vmatmul.mubr.f32.gmra.mrb[8].mxu0 %v283_v48  ;;  %v978_v48 = vld [vmem:[#allocation7 + $0x460] sm:$0xff] }
  0xae   : > { %1631 = vmatprep.mubr.msk.f32.mxu0 %vm330_vm0, %v286_v49  ;;  %1700 = vmatpush1.bf16.msra.mxu0 %v1699_v8  ;;  %v580_v8 = vld [vmem:[#allocation7 + $0x258] sm:$0xff] }
  0xaf   : > { %1702 = vmatprep.subr.bf16.mxu0 %v1701_v15  ;;  %v1715_v15 = vpack.c.bf16 %v575_v3, %v571_v2  ;;  %v1023_v2 = vld [vmem:[#allocation7 + $0x5c8] sm:$0xff] }
  0xb0   : > { %v1027_v3 = vld [vmem:[#allocation7 + $0x5e8] sm:$0xff] }
  0xb1   : > { %457 = vmatmul.mubr.f32.gmra.mrb[10].mxu0 %v285_v50  ;;  %v983_v50 = vld [vmem:[#allocation7 + $0x488] sm:$0xff]  ;;  %v1837_v11 = vpack.c.bf16 %v1027_v3, %v1023_v2 }
  0xb2   : > { %1632 = vmatprep.mubr.msk.f32.mxu0 %vm330_vm0, %v288_v51  ;;  %1704 = vmatpush1.bf16.msra.mxu0 %v1703_v20  ;;  %v987_v51 = vld [vmem:[#allocation7 + $0x4a8] sm:$0xff]  ;;  %v1717_v20 = vpack.c.bf16 %v584_v10, %v580_v8  ;;  %v603_v8 = vld [vmem:[#allocation7 + $0x310] sm:$0xff] }
  0xb3   : > { %1706 = vmatprep.subr.bf16.mxu0 %v1705_v24  ;;  %v1002_v24 = vld [vmem:[#allocation7 + $0x520] sm:$0xff] }
  0xb5   : > { %462 = vmatmul.mubr.f32.gmra.mrb[12].mxu0 %v287_v52 }
  0xb6   : > { %1633 = vmatprep.mubr.msk.f32.mxu0 %vm330_vm0, %v290_v53  ;;  %1708 = vmatpush1.bf16.msra.mxu0 %v1707_v27  ;;  %v592_v27 = vld [vmem:[#allocation7 + $0x2b8] sm:$0xff] }
  0xb7   : > { %1710 = vmatprep.subr.bf16.mxu0 %v1709_v30  ;;  %v1721_v37 = vpack.c.bf16 %v592_v27, %v588_v25  ;;  %v615_v27 = vld [vmem:[#allocation7 + $0x370] sm:$0xff] }
  0xb9   : > { %467 = vmatmul.mubr.f32.gmra.mrb[14].mxu0 %v289_v54  ;;  %v1815_v54 = vpack.c.bf16 %v978_v48, %v974_v47  ;;  %v1019_v47 = vld [vmem:[#allocation7 + $0x5a8] sm:$0xff] }
  0xba   : > { %1634 = vmatprep.mubr.msk.f32.mxu0 %vm330_vm0, %v292_v55  ;;  %1712 = vmatpush1.bf16.msra.mxu0 %v1711_v32  ;;  %v1827_v32 = vpack.c.bf16 %v1002_v24, %v998_v23 }
  0xbb   : > { %1714 = vmatprep.subr.bf16.mxu0 %v1713_v35 }
  0xbd   : > { %472 = vmatmul.mubr.f32.gmra.mrb[16].mxu0 %v291_v56  ;;  %v1817_v56 = vpack.c.bf16 %v987_v51, %v983_v50  ;;  %v1723_v50 = vpack.c.bf16 %v591_v34, %v587_v33  ;;  %v624_v33 = vld [vmem:[#allocation7 + $0x3b8] sm:$0xff] }
  0xbe   : > { %1635 = vmatprep.mubr.msk.f32.mxu0 %vm330_vm0, %v294_v57  ;;  %v982_v57 = vld [vmem:[#allocation7 + $0x480] sm:$0xff]  ;;  %v977_v34 = vld [vmem:[#allocation7 + $0x458] sm:$0xff] }
  0xc1   : > { %477 = vmatmul.mubr.f32.gmra.mrb[18].mxu0 %v293_v58  ;;  %v986_v58 = vld [vmem:[#allocation7 + $0x4a0] sm:$0xff] }
  0xc2   : > { %1636 = vmatprep.mubr.msk.f32.mxu0 %vm330_vm0, %v296_v59  ;;  %v1819_v1 = vpack.c.bf16 %v986_v58, %v982_v57 }
  0xc5   : > { %482 = vmatmul.mubr.f32.gmra.mrb[20].mxu0 %v295_v60  ;;  %v991_v60 = vld [vmem:[#allocation7 + $0x4c8] sm:$0xff] }
  0xc6   : > { %1637 = vmatprep.mubr.msk.f32.mxu0 %vm330_vm0, %v298_v61  ;;  %v995_v61 = vld [vmem:[#allocation7 + $0x4e8] sm:$0xff] }
  0xc7   : > { %v1821_v5 = vpack.c.bf16 %v995_v61, %v991_v60  ;;  %v1018_v60 = vld [vmem:[#allocation7 + $0x5a0] sm:$0xff]  ;;  %v604_v61 = vld [vmem:[#allocation7 + $0x318] sm:$0xff] }
  0xc9   : > { %487 = vmatmul.mubr.f32.gmra.mrb[22].mxu0 %v297_v62 }
  0xca   : > { %697 = vmatprep.mubr.f32.mxu0 %v2221_v21 }
 0x170   : > { %v433_v39 = vpop.f32.mrb[0].mxu0 }
 0x171   : > { %v2497_v42 = vadd.f32 %v2494_v36, %v433_v39  ;;  %v435_v43 = vpop.f32.mrb[1].mxu0  ;;  %v1006_v39 = vld [vmem:[#allocation7 + $0x540] sm:$0xff] }
 0x172   : > { %v1831_v51 = vpack.c.bf16 %v1010_v40, %v1006_v39 }
 0x173   : > { %v492_v45 = vmax.f32 %v2497_v42, 0.0 }
 0x174   : > { %v438_v49 = vpop.f32.mrb[2].mxu0 }
 0x175   : > { %947 = vmatmul.mubr.f32.vlgmr.msra.gmra.mrb[0].mxu1 %v492_v45  ;;  %v2503_v52 = vadd.f32 %v2494_v36, %v438_v49  ;;  %v440_v53 = vpop.f32.mrb[3].mxu0 }
 0x176   : > { %1812 = vmatpush1.bf16.msra.mxu1 %v1811_v44  ;;  %952 = vmatprep.mubr.f32.mxu1 %v2221_v21  ;;  %v600_v44 = vld [vmem:[#allocation7 + $0x2f8] sm:$0xff]  ;;  %v595_v53 = vld [vmem:[#allocation7 + $0x2d0] sm:$0xff] }
 0x177   : > { %v493_v55 = vmax.f32 %v2503_v52, 0.0  ;;  %1814 = vmatprep.subr.bf16.mxu1 %v1813_v46  ;;  %v1015_v46 = vld [vmem:[#allocation7 + $0x588] sm:$0xff]  ;;  %v1725_v57 = vpack.c.bf16 %v600_v44, %v596_v41  ;;  %v1269_v52 = vld [vmem:[#allocation7 + $0x7e0] sm:$0xff] }
 0x178   : > { %v443_v59 = vpop.f32.mrb[4].mxu0  ;;  %v1833_v58 = vpack.c.bf16 %v1019_v47, %v1015_v46  ;;  %v619_v46 = vld [vmem:[#allocation7 + $0x390] sm:$0xff] }
 0x179   : > { %v2508_v62 = vadd.f32 %v2494_v36, %v443_v59  ;;  %v445_v63 = vpop.f32.mrb[5].mxu0  ;;  %953 = vmatmul.mubr.f32.gmra.mrb[2].mxu1 %v493_v55  ;;  %v1014_v59 = vld [vmem:[#allocation7 + $0x580] sm:$0xff]  ;;  %v623_v47 = vld [vmem:[#allocation7 + $0x3b0] sm:$0xff] }
 0x17a   : > { %1816 = vmatpush1.bf16.msra.mxu1 %v1815_v54  ;;  %958 = vmatprep.mubr.f32.mxu1 %v2221_v21  ;;  %v599_v54 = vld [vmem:[#allocation7 + $0x2f0] sm:$0xff]  ;;  %v1835_v7 = vpack.c.bf16 %v1018_v60, %v1014_v59  ;;  %v989_v59 = vld [vmem:[#allocation7 + $0x4b8] sm:$0xff]  ;;  %v1739_v3 = vpack.c.bf16 %v623_v47, %v619_v46  ;;  %v512_v47 = vld [vmem:[#allocation7 + $0x40] sm:$0xff] }
 0x17b   : > { %v494_v4 = vmax.f32 %v2508_v62, 0.0  ;;  %1818 = vmatprep.subr.bf16.mxu1 %v1817_v56  ;;  %v1727_v6 = vpack.c.bf16 %v599_v54, %v595_v53  ;;  %v980_v53 = vld [vmem:[#allocation7 + $0x470] sm:$0xff]  ;;  %v628_v54 = vld [vmem:[#allocation7 + $0x3d8] sm:$0xff] }
 0x17c   : > { %v448_v9 = vpop.f32.mrb[6].mxu0 }
 0x17d   : > { %v2515_v13 = vadd.f32 %v2494_v36, %v448_v9  ;;  %v450_v14 = vpop.f32.mrb[7].mxu0  ;;  %959 = vmatmul.mubr.f32.gmra.mrb[4].mxu1 %v494_v4  ;;  %v607_v9 = vld [vmem:[#allocation7 + $0x330] sm:$0xff] }
 0x17e   : > { %1820 = vmatpush1.bf16.msra.mxu1 %v1819_v1  ;;  %1094 = vmatprep.mubr.f32.mxu1 %v2221_v21  ;;  %v608_v1 = vld [vmem:[#allocation7 + $0x338] sm:$0xff]  ;;  %v1026_v14 = vld [vmem:[#allocation7 + $0x5e0] sm:$0xff]  ;;  %v1731_v24 = vpack.c.bf16 %v607_v9, %v603_v8 }
 0x17f   : > { %v495_v19 = vmax.f32 %v2515_v13, 0.0  ;;  %1822 = vmatprep.subr.bf16.mxu1 %v1821_v5  ;;  %v1729_v10 = vpack.c.bf16 %v608_v1, %v604_v61  ;;  %v1839_v25 = vpack.c.bf16 %v1026_v14, %v1022_v12  ;;  %v505_v12 = vld [vmem:[#allocation7 + $0x8] sm:$0xff]  ;;  %v1017_v13 = vld [vmem:[#allocation7 + $0x598] sm:$0xff] }
 0x180   : > { %v453_v26 = vpop.f32.mrb[8].mxu0  ;;  %v509_v14 = vld [vmem:[#allocation7 + $0x28] sm:$0xff] }
 0x181   : > { %698 = vmatmul.mubr.f32.vlgmr.msra.gmra.mrb[24].mxu0 %v495_v19  ;;  %v2524_v30 = vadd.f32 %v2494_v36, %v453_v26  ;;  %v455_v31 = vpop.f32.mrb[9].mxu0  ;;  %v611_v26 = vld [vmem:[#allocation7 + $0x350] sm:$0xff] }
 0x182   : > { %1716 = vmatpush1.bf16.msra.mxu0 %v1715_v15  ;;  %1824 = vmatpush1.bf16.msra.mxu1 %v1823_v16  ;;  %v612_v15 = vld [vmem:[#allocation7 + $0x358] sm:$0xff]  ;;  %v968_v31 = vld [vmem:[#allocation7 + $0x410] sm:$0xff] }
 0x183   : > { %1718 = vmatprep.subr.bf16.mxu0 %v1717_v20  ;;  %1826 = vmatprep.subr.bf16.mxu1 %v1825_v22  ;;  %v496_v35 = vmax.f32 %v2524_v30, 0.0  ;;  %v616_v16 = vld [vmem:[#allocation7 + $0x378] sm:$0xff] }
 0x184   : > { %v458_v43 = vpop.f32.mrb[10].mxu0  ;;  %703 = vmatprep.mubr.f32.mxu0 %v2221_v21  ;;  %v1733_v28 = vpack.c.bf16 %v616_v16, %v612_v15  ;;  %v993_v15 = vld [vmem:[#allocation7 + $0x4d8] sm:$0xff] }
 0x185   : > { %v2529_v48 = vadd.f32 %v2494_v36, %v458_v43  ;;  %v460_v49 = vpop.f32.mrb[11].mxu0  ;;  %704 = vmatmul.mubr.f32.gmra.mrb[26].mxu0 %v496_v35  ;;  %v1735_v43 = vpack.c.bf16 %v615_v27, %v611_v26  ;;  %v997_v16 = vld [vmem:[#allocation7 + $0x4f8] sm:$0xff]  ;;  %v504_v26 = vld [vmem:[#allocation7] sm:$0xff]  ;;  %v1745_v27 = vpack.c.bf16 %v509_v14, %v505_v12 }
 0x186   : > { %1720 = vmatpush1.bf16.msra.mxu0 %v1719_v0  ;;  %1828 = vmatpush1.bf16.msra.mxu1 %v1827_v32  ;;  %v972_v0 = vld [vmem:[#allocation7 + $0x430] sm:$0xff]  ;;  %v620_v32 = vld [vmem:[#allocation7 + $0x398] sm:$0xff] }
 0x187   : > { %1722 = vmatprep.subr.bf16.mxu0 %v1721_v37  ;;  %1830 = vmatprep.subr.bf16.mxu1 %v1829_v38  ;;  %v497_v56 = vmax.f32 %v2529_v48, 0.0  ;;  %v981_v37 = vld [vmem:[#allocation7 + $0x478] sm:$0xff]  ;;  %v1843_v44 = vpack.c.bf16 %v972_v0, %v968_v31  ;;  %v1737_v49 = vpack.c.bf16 %v624_v33, %v620_v32  ;;  %v992_v31 = vld [vmem:[#allocation7 + $0x4d0] sm:$0xff]  ;;  %v513_v32 = vld [vmem:[#allocation7 + $0x48] sm:$0xff] }
 0x188   : > { %v463_v63 = vpop.f32.mrb[12].mxu0  ;;  %709 = vmatprep.mubr.f32.mxu0 %v2221_v21  ;;  %v996_v0 = vld [vmem:[#allocation7 + $0x4f0] sm:$0xff]  ;;  %v517_v33 = vld [vmem:[#allocation7 + $0x68] sm:$0xff] }
 0x189   : > { %v465_v5 = vpop.f32.mrb[13].mxu0  ;;  %710 = vmatmul.mubr.f32.gmra.mrb[28].mxu0 %v497_v56  ;;  %v2539_v22 = vadd.f32 %v2494_v36, %v463_v63  ;;  %v1855_v46 = vpack.c.bf16 %v996_v0, %v992_v31  ;;  %v536_v31 = vld [vmem:[#allocation7 + $0x100] sm:$0xff] }
 0x18a   : > { %1724 = vmatpush1.bf16.msra.mxu0 %v1723_v50  ;;  %1832 = vmatpush1.bf16.msra.mxu1 %v1831_v51  ;;  %v1845_v50 = vpack.c.bf16 %v981_v37, %v977_v34  ;;  %v976_v51 = vld [vmem:[#allocation7 + $0x450] sm:$0xff]  ;;  %v1001_v37 = vld [vmem:[#allocation7 + $0x518] sm:$0xff]  ;;  %v540_v0 = vld [vmem:[#allocation7 + $0x120] sm:$0xff] }
 0x18b   : > { %1726 = vmatprep.subr.bf16.mxu0 %v1725_v57  ;;  %1834 = vmatprep.subr.bf16.mxu1 %v1833_v58  ;;  %v498_v39 = vmax.f32 %v2539_v22, 0.0  ;;  %v632_v57 = vld [vmem:[#allocation7 + $0x3f8] sm:$0xff]  ;;  %v1847_v5 = vpack.c.bf16 %v980_v53, %v976_v51  ;;  %v1000_v51 = vld [vmem:[#allocation7 + $0x510] sm:$0xff]  ;;  %v1763_v48 = vpack.c.bf16 %v540_v0, %v536_v31  ;;  %v1246_v31 = vld [vmem:[#allocation7 + $0x728] sm:$0xff] }
 0x18c   : > { %780 = vmatprep.mubr.f32.mxu0 %v2221_v21  ;;  %v468_v20 = vpop.f32.mrb[14].mxu0  ;;  %v985_v58 = vld [vmem:[#allocation7 + $0x498] sm:$0xff]  ;;  %v1741_v8 = vpack.c.bf16 %v632_v57, %v628_v54  ;;  %v1004_v53 = vld [vmem:[#allocation7 + $0x530] sm:$0xff]  ;;  %v521_v57 = vld [vmem:[#allocation7 + $0x88] sm:$0xff] }
 0x18d   : > { %v470_v23 = vpop.f32.mrb[15].mxu0  ;;  %v2543_v40 = vadd.f32 %v2494_v36, %v468_v20  ;;  %v1849_v9 = vpack.c.bf16 %v989_v59, %v985_v58  ;;  %v525_v58 = vld [vmem:[#allocation7 + $0xa8] sm:$0xff]  ;;  %v1013_v59 = vld [vmem:[#allocation7 + $0x578] sm:$0xff]  ;;  %v1241_v0 = vld [vmem:[#allocation7 + $0x700] sm:$0xff] }
 0x18e   : > { %1728 = vmatpush1.bf16.msra.mxu0 %v1727_v6  ;;  %1836 = vmatpush1.bf16.msra.mxu1 %v1835_v7  ;;  %v627_v6 = vld [vmem:[#allocation7 + $0x3d0] sm:$0xff] }
 0x18f   : > { %1730 = vmatprep.subr.bf16.mxu0 %v1729_v10  ;;  %1838 = vmatprep.subr.bf16.mxu1 %v1837_v11  ;;  %v499_v61 = vmax.f32 %v2543_v40, 0.0  ;;  %v631_v7 = vld [vmem:[#allocation7 + $0x3f0] sm:$0xff] }
 0x190   : > { %v473_v38 = vpop.f32.mrb[16].mxu0  ;;  %v984_v10 = vld [vmem:[#allocation7 + $0x490] sm:$0xff] }
 0x191   : > { %v475_v41 = vpop.f32.mrb[17].mxu0  ;;  %v2549_v63 = vadd.f32 %v2494_v36, %v473_v38  ;;  %v988_v11 = vld [vmem:[#allocation7 + $0x4b0] sm:$0xff]  ;;  %v1005_v38 = vld [vmem:[#allocation7 + $0x538] sm:$0xff] }
 0x192   : > { %1732 = vmatpush1.bf16.msra.mxu0 %v1731_v24  ;;  %1840 = vmatpush1.bf16.msra.mxu1 %v1839_v25  ;;  %v1743_v24 = vpack.c.bf16 %v631_v7, %v627_v6  ;;  %v1851_v25 = vpack.c.bf16 %v988_v11, %v984_v10  ;;  %v1857_v54 = vpack.c.bf16 %v1005_v38, %v1001_v37  ;;  %v1008_v7 = vld [vmem:[#allocation7 + $0x550] sm:$0xff]  ;;  %v533_v11 = vld [vmem:[#allocation7 + $0xe8] sm:$0xff] }
 0x193   : > { %1734 = vmatprep.subr.bf16.mxu0 %v1733_v28  ;;  %1842 = vmatprep.subr.bf16.mxu1 %v1841_v29  ;;  %v500_v18 = vmax.f32 %v2549_v63, 0.0  ;;  %v1853_v28 = vpack.c.bf16 %v997_v16, %v993_v15  ;;  %v508_v29 = vld [vmem:[#allocation7 + $0x20] sm:$0xff]  ;;  %v1753_v6 = vpack.c.bf16 %v525_v58, %v521_v57  ;;  %v1028_v37 = vld [vmem:[#allocation7 + $0x5f0] sm:$0xff]  ;;  %v545_v38 = vld [vmem:[#allocation7 + $0x148] sm:$0xff] }
 0x194   : > { %v478_v60 = vpop.f32.mrb[18].mxu0  ;;  %v528_v15 = vld [vmem:[#allocation7 + $0xc0] sm:$0xff]  ;;  %v553_v57 = vld [vmem:[#allocation7 + $0x188] sm:$0xff] }
 0x195   : > { %1095 = vmatmul.mubr.f32.vlgmr.msra.gmra.mrb[6].mxu1 %v498_v39  ;;  %v2552_v1 = vadd.f32 %v2494_v36, %v478_v60  ;;  %v480_v2 = vpop.f32.mrb[19].mxu0  ;;  %v532_v16 = vld [vmem:[#allocation7 + $0xe0] sm:$0xff]  ;;  %v557_v58 = vld [vmem:[#allocation7 + $0x1a8] sm:$0xff] }
 0x196   : > { %1736 = vmatpush1.bf16.msra.mxu0 %v1735_v43  ;;  %1844 = vmatpush1.bf16.msra.mxu1 %v1843_v44  ;;  %v1747_v44 = vpack.c.bf16 %v508_v29, %v504_v26  ;;  %v1859_v2 = vpack.c.bf16 %v1004_v53, %v1000_v51  ;;  %v537_v26 = vld [vmem:[#allocation7 + $0x108] sm:$0xff]  ;;  %v1029_v29 = vld [vmem:[#allocation7 + $0x5f8] sm:$0xff]  ;;  %v1759_v30 = vpack.c.bf16 %v532_v16, %v528_v15  ;;  %v548_v51 = vld [vmem:[#allocation7 + $0x160] sm:$0xff] }
 0x197   : > { %1738 = vmatprep.subr.bf16.mxu0 %v1737_v49  ;;  %1846 = vmatprep.subr.bf16.mxu1 %v1845_v50  ;;  %v1749_v49 = vpack.c.bf16 %v517_v33, %v513_v32  ;;  %v516_v50 = vld [vmem:[#allocation7 + $0x60] sm:$0xff] }
 0x198   : > { %1100 = vmatprep.mubr.f32.mxu1 %v2221_v21  ;;  %v483_v17 = vpop.f32.mrb[20].mxu0  ;;  %v1751_v60 = vpack.c.bf16 %v516_v50, %v512_v47  ;;  %v544_v47 = vld [vmem:[#allocation7 + $0x140] sm:$0xff] }
 0x199   : > { %1101 = vmatmul.mubr.f32.gmra.mrb[8].mxu1 %v499_v61  ;;  %v2559_v20 = vadd.f32 %v2494_v36, %v483_v17  ;;  %v485_v23 = vpop.f32.mrb[21].mxu0  ;;  %v1209_v53 = vld [vmem:[#allocation7 + $0x600] sm:$0xff] }
 0x19a   : > { %1740 = vmatpush1.bf16.msra.mxu0 %v1739_v3  ;;  %1848 = vmatpush1.bf16.msra.mxu1 %v1847_v5  ;;  %v520_v3 = vld [vmem:[#allocation7 + $0x80] sm:$0xff] }
 0x19b   : > { %1742 = vmatprep.subr.bf16.mxu0 %v1741_v8  ;;  %1850 = vmatprep.subr.bf16.mxu1 %v1849_v9  ;;  %v524_v5 = vld [vmem:[#allocation7 + $0xa0] sm:$0xff]  ;;  %v1012_v8 = vld [vmem:[#allocation7 + $0x570] sm:$0xff]  ;;  %v529_v9 = vld [vmem:[#allocation7 + $0xc8] sm:$0xff] }
 0x19c   : > { %1106 = vmatprep.mubr.f32.mxu1 %v2221_v21  ;;  %v488_v34 = vpop.f32.mrb[22].mxu0  ;;  %v1755_v12 = vpack.c.bf16 %v524_v5, %v520_v3  ;;  %v1863_v14 = vpack.c.bf16 %v1012_v8, %v1008_v7  ;;  %v1757_v17 = vpack.c.bf16 %v533_v11, %v529_v9  ;;  %v552_v3 = vld [vmem:[#allocation7 + $0x180] sm:$0xff]  ;;  %v1769_v5 = vpack.c.bf16 %v557_v58, %v553_v57  ;;  %v565_v11 = vld [vmem:[#allocation7 + $0x1e8] sm:$0xff]  ;;  %v1211_v58 = vld [vmem:[#allocation7 + $0x610] sm:$0xff] }
 0x19d   : > { %1107 = vmatmul.mubr.f32.gmra.mrb[10].mxu1 %v500_v18  ;;  %v2565_v41 = vadd.f32 %v2494_v36, %v488_v34  ;;  %v490_v43 = vpop.f32.mrb[23].mxu0  ;;  %v1009_v36 = vld [vmem:[#allocation7 + $0x558] sm:$0xff]  ;;  %v1024_v34 = vld [vmem:[#allocation7 + $0x5d0] sm:$0xff]  ;;  %v1217_v7 = vld [vmem:[#allocation7 + $0x640] sm:$0xff] }
 0x19e   : > { %1744 = vmatpush1.bf16.msra.mxu0 %v1743_v24  ;;  %1852 = vmatpush1.bf16.msra.mxu1 %v1851_v25  ;;  %v1861_v10 = vpack.c.bf16 %v1013_v59, %v1009_v36  ;;  %v1016_v24 = vld [vmem:[#allocation7 + $0x590] sm:$0xff]  ;;  %v549_v43 = vld [vmem:[#allocation7 + $0x168] sm:$0xff]  ;;  %v1221_v8 = vld [vmem:[#allocation7 + $0x660] sm:$0xff] }
 0x19f   : > { %1746 = vmatprep.subr.bf16.mxu0 %v1745_v27  ;;  %1854 = vmatprep.subr.bf16.mxu1 %v1853_v28  ;;  %v1020_v25 = vld [vmem:[#allocation7 + $0x5b0] sm:$0xff]  ;;  %v541_v27 = vld [vmem:[#allocation7 + $0x128] sm:$0xff]  ;;  %v1025_v28 = vld [vmem:[#allocation7 + $0x5d8] sm:$0xff] }
 0x1a0   : > { %1177 = vmatprep.mubr.f32.mxu1 %v2221_v21  ;;  %v1761_v32 = vpack.c.bf16 %v541_v27, %v537_v26  ;;  %v1869_v33 = vpack.c.bf16 %v1029_v29, %v1025_v28  ;;  %v1218_v36 = vld [vmem:[#allocation7 + $0x648] sm:$0xff]  ;;  %v560_v15 = vld [vmem:[#allocation7 + $0x1c0] sm:$0xff] }
 0x1a1   : > { %781 = vmatmul.mubr.f32.vlgmr.msra.gmra.mrb[30].mxu0 %v495_v19  ;;  %v1021_v19 = vld [vmem:[#allocation7 + $0x5b8] sm:$0xff]  ;;  %v1222_v59 = vld [vmem:[#allocation7 + $0x668] sm:$0xff]  ;;  %v1233_v29 = vld [vmem:[#allocation7 + $0x6c0] sm:$0xff] }
 0x1a2   : > { %1748 = vmatpush1.bf16.msra.mxu0 %v1747_v44  ;;  %1856 = vmatpush1.bf16.msra.mxu1 %v1855_v46  ;;  %v1865_v23 = vpack.c.bf16 %v1021_v19, %v1017_v13  ;;  %v1210_v44 = vld [vmem:[#allocation7 + $0x608] sm:$0xff]  ;;  %v1877_v9 = vpack.c.bf16 %v1222_v59, %v1218_v36  ;;  %v1215_v36 = vld [vmem:[#allocation7 + $0x630] sm:$0xff]  ;;  %v1220_v59 = vld [vmem:[#allocation7 + $0x658] sm:$0xff] }
 0x1a3   : > { %786 = vmatprep.mubr.f32.mxu0 %v2221_v21  ;;  %1750 = vmatprep.subr.bf16.mxu0 %v1749_v49  ;;  %v1214_v46 = vld [vmem:[#allocation7 + $0x628] sm:$0xff]  ;;  %v1765_v49 = vpack.c.bf16 %v549_v43, %v545_v38  ;;  %v1253_v38 = vld [vmem:[#allocation7 + $0x760] sm:$0xff]  ;;  %v1907_v62 = vpack.c.bf16 %v1215_v36, %v1211_v58 }
 0x1a4   : > { %1858 = vmatprep.subr.bf16.mxu1 %v1857_v54  ;;  %v1873_v50 = vpack.c.bf16 %v1214_v46, %v1210_v44  ;;  %v1213_v54 = vld [vmem:[#allocation7 + $0x620] sm:$0xff]  ;;  %v1226_v13 = vld [vmem:[#allocation7 + $0x688] sm:$0xff] }
 0x1a5   : > { %787 = vmatmul.mubr.f32.gmra.mrb[32].mxu0 %v496_v35  ;;  %v1867_v35 = vpack.c.bf16 %v1020_v25, %v1016_v24  ;;  %v1230_v19 = vld [vmem:[#allocation7 + $0x6a8] sm:$0xff]  ;;  %v1229_v24 = vld [vmem:[#allocation7 + $0x6a0] sm:$0xff] }
 0x1a6   : > { %1752 = vmatpush1.bf16.msra.mxu0 %v1751_v60  ;;  %1860 = vmatpush1.bf16.msra.mxu1 %v1859_v2  ;;  %v1767_v60 = vpack.c.bf16 %v548_v51, %v544_v47  ;;  %v1875_v2 = vpack.c.bf16 %v1213_v54, %v1209_v53  ;;  %v1881_v25 = vpack.c.bf16 %v1230_v19, %v1226_v13  ;;  %v1234_v26 = vld [vmem:[#allocation7 + $0x6c8] sm:$0xff]  ;;  %v1265_v51 = vld [vmem:[#allocation7 + $0x7c0] sm:$0xff]  ;;  %v1216_v53 = vld [vmem:[#allocation7 + $0x638] sm:$0xff] }
 0x1a7   : > { %792 = vmatprep.mubr.f32.mxu0 %v2221_v21  ;;  %1754 = vmatprep.subr.bf16.mxu0 %v1753_v6  ;;  %v556_v6 = vld [vmem:[#allocation7 + $0x1a0] sm:$0xff]  ;;  %v1238_v27 = vld [vmem:[#allocation7 + $0x6e8] sm:$0xff]  ;;  %v1903_v54 = vpack.c.bf16 %v1269_v52, %v1265_v51  ;;  %v1231_v13 = vld [vmem:[#allocation7 + $0x6b0] sm:$0xff] }
 0x1a8   : > { %1862 = vmatprep.subr.bf16.mxu1 %v1861_v10  ;;  %v561_v10 = vld [vmem:[#allocation7 + $0x1c8] sm:$0xff]  ;;  %v1885_v28 = vpack.c.bf16 %v1238_v27, %v1234_v26  ;;  %v1236_v19 = vld [vmem:[#allocation7 + $0x6d8] sm:$0xff]  ;;  %v1243_v27 = vld [vmem:[#allocation7 + $0x710] sm:$0xff] }
 0x1a9   : > { %793 = vmatmul.mubr.f32.gmra.mrb[34].mxu0 %v497_v56  ;;  %v1871_v56 = vpack.c.bf16 %v1028_v37, %v1024_v34  ;;  %v1773_v16 = vpack.c.bf16 %v565_v11, %v561_v10  ;;  %v1254_v34 = vld [vmem:[#allocation7 + $0x768] sm:$0xff]  ;;  %v1227_v11 = vld [vmem:[#allocation7 + $0x690] sm:$0xff] }
 0x1aa   : > { %1756 = vmatpush1.bf16.msra.mxu0 %v1755_v12  ;;  %1864 = vmatpush1.bf16.msra.mxu1 %v1863_v14  ;;  %v1771_v12 = vpack.c.bf16 %v556_v6, %v552_v3  ;;  %v1879_v14 = vpack.c.bf16 %v1221_v8, %v1217_v7  ;;  %v1258_v43 = vld [vmem:[#allocation7 + $0x788] sm:$0xff]  ;;  %v1219_v3 = vld [vmem:[#allocation7 + $0x650] sm:$0xff]  ;;  %v1228_v6 = vld [vmem:[#allocation7 + $0x698] sm:$0xff]  ;;  %v502_v8 = vmax.f32 %v2559_v20, 0.0  ;;  %v1915_v20 = vpack.c.bf16 %v1231_v13, %v1227_v11 }
 0x1ab   : > { %1758 = vmatprep.subr.bf16.mxu0 %v1757_v17  ;;  %1866 = vmatprep.subr.bf16.mxu1 %v1865_v23  ;;  %v564_v17 = vld [vmem:[#allocation7 + $0x1e0] sm:$0xff]  ;;  %v1262_v44 = vld [vmem:[#allocation7 + $0x7a8] sm:$0xff]  ;;  %v1232_v7 = vld [vmem:[#allocation7 + $0x6b8] sm:$0xff] }
 0x1ac   : > { %863 = vmatprep.mubr.f32.mxu0 %v2221_v21  ;;  %v1225_v23 = vld [vmem:[#allocation7 + $0x680] sm:$0xff]  ;;  %v1775_v22 = vpack.c.bf16 %v564_v17, %v560_v15  ;;  %v1897_v42 = vpack.c.bf16 %v1262_v44, %v1258_v43  ;;  %v1270_v47 = vld [vmem:[#allocation7 + $0x7e8] sm:$0xff]  ;;  %v1913_v10 = vpack.c.bf16 %v1232_v7, %v1228_v6  ;;  %v1239_v17 = vld [vmem:[#allocation7 + $0x6f0] sm:$0xff] }
 0x1ad   : > { %v1271_v43 = vld [vmem:[#allocation7 + $0x7f0] sm:$0xff] }
 0x1ae   : > { %1760 = vmatpush1.bf16.msra.mxu0 %v1759_v30  ;;  %1868 = vmatpush1.bf16.msra.mxu1 %v1867_v35  ;;  %v1237_v30 = vld [vmem:[#allocation7 + $0x6e0] sm:$0xff]  ;;  %v1242_v35 = vld [vmem:[#allocation7 + $0x708] sm:$0xff] }
 0x1af   : > { %1762 = vmatprep.subr.bf16.mxu0 %v1761_v32  ;;  %1870 = vmatprep.subr.bf16.mxu1 %v1869_v33  ;;  %v1887_v40 = vpack.c.bf16 %v1237_v30, %v1233_v29  ;;  %v1245_v32 = vld [vmem:[#allocation7 + $0x720] sm:$0xff]  ;;  %v1250_v33 = vld [vmem:[#allocation7 + $0x748] sm:$0xff]  ;;  %v1251_v30 = vld [vmem:[#allocation7 + $0x750] sm:$0xff] }
 0x1b0   : > { %v1891_v37 = vpack.c.bf16 %v1245_v32, %v1241_v0  ;;  %v1893_v63 = vpack.c.bf16 %v1254_v34, %v1250_v33  ;;  %v1259_v32 = vld [vmem:[#allocation7 + $0x790] sm:$0xff]  ;;  %v1268_v34 = vld [vmem:[#allocation7 + $0x7d8] sm:$0xff] }
 0x1b1   : > { %v1263_v33 = vld [vmem:[#allocation7 + $0x7b0] sm:$0xff] }
 0x1b2   : > { %1764 = vmatpush1.bf16.msra.mxu0 %v1763_v48  ;;  %1872 = vmatpush1.bf16.msra.mxu1 %v1871_v56  ;;  %v1261_v48 = vld [vmem:[#allocation7 + $0x7a0] sm:$0xff]  ;;  %v1266_v56 = vld [vmem:[#allocation7 + $0x7c8] sm:$0xff] }
 0x1b3   : > { %1766 = vmatprep.subr.bf16.mxu0 %v1765_v49  ;;  %1874 = vmatprep.subr.bf16.mxu1 %v1873_v50  ;;  %v1901_v50 = vpack.c.bf16 %v1270_v47, %v1266_v56 }
 0x1b5   : > { %1178 = vmatmul.mubr.f32.vlgmr.msra.gmra.mrb[0].mxu1 %v498_v39  ;;  %v1883_v39 = vpack.c.bf16 %v1229_v24, %v1225_v23  ;;  %v1244_v23 = vld [vmem:[#allocation7 + $0x718] sm:$0xff] }
 0x1b6   : > { %1768 = vmatpush1.bf16.msra.mxu0 %v1767_v60  ;;  %1876 = vmatpush1.bf16.msra.mxu1 %v1875_v2  ;;  %v1224_v60 = vld [vmem:[#allocation7 + $0x678] sm:$0xff]  ;;  %v501_v2 = vmax.f32 %v2552_v1, 0.0  ;;  %v1453_v1 = vlaneseq }
 0x1b7   : > { %1183 = vmatprep.mubr.f32.mxu1 %v2221_v21  ;;  %1770 = vmatprep.subr.bf16.mxu0 %v1769_v5  ;;  %v1223_v5 = vld [vmem:[#allocation7 + $0x670] sm:$0xff]  ;;  %v1248_v24 = vld [vmem:[#allocation7 + $0x738] sm:$0xff] }
 0x1b8   : > { %1878 = vmatprep.subr.bf16.mxu1 %v1877_v9  ;;  %v1911_v9 = vpack.c.bf16 %v1223_v5, %v1219_v3  ;;  %v1921_v26 = vpack.c.bf16 %v1248_v24, %v1244_v23 }
 0x1b9   : > { %1184 = vmatmul.mubr.f32.gmra.mrb[2].mxu1 %v499_v61  ;;  %v1889_v61 = vpack.c.bf16 %v1246_v31, %v1242_v35  ;;  %v1255_v35 = vld [vmem:[#allocation7 + $0x770] sm:$0xff]  ;;  %v1260_v31 = vld [vmem:[#allocation7 + $0x798] sm:$0xff] }
 0x1ba   : > { %1772 = vmatpush1.bf16.msra.mxu0 %v1771_v12  ;;  %1880 = vmatpush1.bf16.msra.mxu1 %v1879_v14  ;;  %v1240_v12 = vld [vmem:[#allocation7 + $0x6f8] sm:$0xff]  ;;  %v503_v14 = vmax.f32 %v2565_v41, 0.0  ;;  %v1247_v41 = vld [vmem:[#allocation7 + $0x730] sm:$0xff] }
 0x1bb   : > { %1189 = vmatprep.mubr.f32.mxu1 %v2221_v21  ;;  %1774 = vmatprep.subr.bf16.mxu0 %v1773_v16  ;;  %v1917_v15 = vpack.c.bf16 %v1240_v12, %v1236_v19  ;;  %v1235_v16 = vld [vmem:[#allocation7 + $0x6d0] sm:$0xff] }
 0x1bc   : > { %1882 = vmatprep.subr.bf16.mxu1 %v1881_v25  ;;  %v1919_v25 = vpack.c.bf16 %v1239_v17, %v1235_v16 }
 0x1bd   : > { %1190 = vmatmul.mubr.f32.gmra.mrb[4].mxu1 %v500_v18  ;;  %v1249_v18 = vld [vmem:[#allocation7 + $0x740] sm:$0xff] }
 0x1be   : > { %1776 = vmatpush1.bf16.msra.mxu0 %v1775_v22  ;;  %1884 = vmatpush1.bf16.msra.mxu1 %v1883_v39  ;;  %v1895_v46 = vpack.c.bf16 %v1253_v38, %v1249_v18  ;;  %v1252_v22 = vld [vmem:[#allocation7 + $0x758] sm:$0xff]  ;;  %v1267_v38 = vld [vmem:[#allocation7 + $0x7d0] sm:$0xff] }
 0x1bf   : > { %1886 = vmatprep.subr.bf16.mxu1 %v1885_v28  ;;  %1337 = vmatprep.mubr.f32.mxu1 %v2221_v21  ;;  %v1256_v39 = vld [vmem:[#allocation7 + $0x778] sm:$0xff]  ;;  %v1923_v28 = vpack.c.bf16 %v1247_v41, %v1243_v27  ;;  %v1935_v44 = vpack.c.bf16 %v1271_v43, %v1267_v38 }
 0x1c0   : > { %v1925_v29 = vpack.c.bf16 %v1256_v39, %v1252_v22 }
 0x1c1   : > { %864 = vmatmul.mubr.f32.vlgmr.msra.gmra.mrb[24].mxu0 %v492_v45  ;;  %v1257_v45 = vld [vmem:[#allocation7 + $0x780] sm:$0xff] }
 0x1c2   : > { %1888 = vmatpush1.bf16.msra.mxu1 %v1887_v40  ;;  %869 = vmatprep.mubr.f32.mxu0 %v2221_v21  ;;  %v1899_v49 = vpack.c.bf16 %v1261_v48, %v1257_v45  ;;  %v1264_v40 = vld [vmem:[#allocation7 + $0x7b8] sm:$0xff] }
 0x1c3   : > { %1890 = vmatprep.subr.bf16.mxu1 %v1889_v61  ;;  %v1927_v61 = vpack.c.bf16 %v1255_v35, %v1251_v30  ;;  %v1929_v0 = vpack.c.bf16 %v1264_v40, %v1260_v31 }
 0x1c5   : > { %870 = vmatmul.mubr.f32.gmra.mrb[26].mxu0 %v493_v55  ;;  %v1212_v55 = vld [vmem:[#allocation7 + $0x618] sm:$0xff] }
 0x1c6   : > { %1892 = vmatpush1.bf16.msra.mxu1 %v1891_v37  ;;  %875 = vmatprep.mubr.f32.mxu0 %v2221_v21  ;;  %v1905_v57 = vpack.c.bf16 %v1216_v53, %v1212_v55  ;;  %v1272_v37 = vld [vmem:[#allocation7 + $0x7f8] sm:$0xff] }
 0x1c7   : > { %1894 = vmatprep.subr.bf16.mxu1 %v1893_v63  ;;  %v1931_v63 = vpack.c.bf16 %v1263_v33, %v1259_v32  ;;  %v1933_v18 = vpack.c.bf16 %v1272_v37, %v1268_v34 }
 0x1c9   : > { %876 = vmatmul.mubr.f32.gmra.mrb[28].mxu0 %v494_v4  ;;  %v1909_v4 = vpack.c.bf16 %v1224_v60, %v1220_v59 }
 0x1ca   : > { %1896 = vmatpush1.bf16.msra.mxu1 %v1895_v46 }
 0x1cb   : > { %1898 = vmatprep.subr.bf16.mxu1 %v1897_v42 }
 0x1ce   : > { %1900 = vmatpush1.bf16.msra.mxu1 %v1899_v49 }
 0x1cf   : > { %1902 = vmatprep.subr.bf16.mxu1 %v1901_v50 }
 0x1d2   : > { %1904 = vmatpush1.bf16.msra.mxu1 %v1903_v54  ;;  %v1454_v54 = vshrl.u32 %v1453_v1, 7 }
 0x1d3   : > { %1906 = vmatprep.subr.bf16.mxu1 %v1905_v57 }
 0x1d4   : > { %v1455_v57 = vsub.s32 0, %v1454_v54  ;;  %v1459_v58 = vsub.s32 1, %v1454_v54  ;;  %v1463_v39 = vsub.s32 2, %v1454_v54 }
 0x1d5   : > { %1338 = vmatmul.mubr.f32.vlgmr.msra.gmra.mrb[6].mxu1 %v501_v2 }
 0x1d6   : > { %1908 = vmatpush1.bf16.msra.mxu1 %v1907_v62  ;;  %1343 = vmatprep.mubr.f32.mxu1 %v2221_v21 }
 0x1d7   : > { %1910 = vmatprep.subr.bf16.mxu1 %v1909_v4 }
 0x1d9   : > { %1344 = vmatmul.mubr.f32.gmra.mrb[8].mxu1 %v502_v8 }
 0x1da   : > { %1912 = vmatpush1.bf16.msra.mxu1 %v1911_v9  ;;  %1349 = vmatprep.mubr.f32.mxu1 %v2221_v21 }
 0x1db   : > { %1914 = vmatprep.subr.bf16.mxu1 %v1913_v10 }
 0x1dd   : > { %1350 = vmatmul.mubr.f32.gmra.mrb[10].mxu1 %v503_v14 }
 0x1de   : > { %1916 = vmatpush1.bf16.msra.mxu1 %v1915_v20  ;;  %1420 = vmatprep.mubr.f32.mxu1 %v2221_v21 }
 0x1df   : > { %1918 = vmatprep.subr.bf16.mxu1 %v1917_v15 }
 0x1e2   : > { %1920 = vmatpush1.bf16.msra.mxu1 %v1919_v25 }
 0x1e3   : > { %1922 = vmatprep.subr.bf16.mxu1 %v1921_v26 }
 0x1e6   : > { %1924 = vmatpush1.bf16.msra.mxu1 %v1923_v28  ;;  %v1467_v28 = vsub.s32 3, %v1454_v54 }
 0x1e7   : > { %1926 = vmatprep.subr.bf16.mxu1 %v1925_v29 }
 0x1ea   : > { %1928 = vmatpush1.bf16.msra.mxu1 %v1927_v61 }
 0x1eb   : > { %1930 = vmatprep.subr.bf16.mxu1 %v1929_v0 }
 0x1ee   : > { %1932 = vmatpush1.bf16.msra.mxu1 %v1931_v63 }
 0x1ef   : > { %1934 = vmatprep.subr.bf16.mxu1 %v1933_v18 }
 0x1f2   : > { %1936 = vmatpush1.bf16.msra.mxu1 %v1935_v44 }
 0x1f5   : > { %1421 = vmatmul.mubr.f32.vlgmr.msra.gmra.mrb[0].mxu1 %v501_v2 }
 0x1f6   : > { %1426 = vmatprep.mubr.f32.mxu1 %v2221_v21 }
 0x1f9   : > { %1427 = vmatmul.mubr.f32.gmra.mrb[2].mxu1 %v502_v8 }
 0x1fa   : > { %1432 = vmatprep.mubr.f32.mxu1 %v2221_v21  ;;  %v1451_v21 = vld [vmem:[%s2670_s4] sm:$0xf] }
 0x1fb   : > { %v1456_v36 = vrot.slane %v1451_v21, %v1455_v57  ;;  %v1460_v60 = vrot.slane %v1451_v21, %v1459_v58  ;;  %v1464_v29 = vrot.slane %v1451_v21, %v1463_v39  ;;  %v1468_v35 = vrot.slane %v1451_v21, %v1467_v28 }
 0x1fd   : > { %1433 = vmatmul.mubr.f32.gmra.mrb[4].mxu1 %v503_v14 }
 0x274   : > { %v782_v46 = vpop.f32.mrb[30].mxu0 }
 0x275   : > { %v784_v42 = vpop.f32.mrb[31].mxu0 }
 0x278   : > { %v788_v45 = vpop.f32.mrb[32].mxu0 }
 0x279   : > { %v790_v48 = vpop.f32.mrb[33].mxu0 }
 0x27c   : > { %v2606_v56 = vpop.f32.mrb[34].mxu0 }
 0x27d   : > { %v2608_v47 = vpop.f32.mrb[35].mxu0 }
 0x294   : > { %v865_v49 = vpop.f32.mrb[24].mxu0 }
 0x295   : > { %v867_v50 = vpop.f32.mrb[25].mxu0 }
 0x298   : > { %v871_v51 = vpop.f32.mrb[26].mxu0 }
 0x299   : > { %v873_v52 = vpop.f32.mrb[27].mxu0 }
 0x29c   : > { %v877_v55 = vpop.f32.mrb[28].mxu0 }
 0x29d   : > { %v879_v53 = vpop.f32.mrb[29].mxu0 }
 0x2a8   : > { %v1339_v59 = vpop.f32.mrb[6].mxu1 }
 0x2a9   : > { %v1937_v2 = vadd.f32 %v1339_v59, %v865_v49  ;;  %v1341_v62 = vpop.f32.mrb[7].mxu1 }
 0x2aa   : > { %v1938_v4 = vadd.f32 %v1341_v62, %v867_v50 }
 0x2ab   : > { %v1473_v3 = vadd.f32 %v1937_v2, %v1456_v36 }
 0x2ac   : > { %v1474_v5 = vadd.f32 %v1938_v4, %v1460_v60  ;;  %v1345_v6 = vpop.f32.mrb[8].mxu1 }
 0x2ad   : > { %v1485_v7 = vmax.f32 %v1473_v3, 0.0  ;;  %v1939_v8 = vadd.f32 %v1345_v6, %v871_v51  ;;  %v1347_v9 = vpop.f32.mrb[9].mxu1 }
 0x2ae   : > { %v1486_v10 = vmax.f32 %v1474_v5, 0.0  ;;  %v1940_v11 = vadd.f32 %v1347_v9, %v873_v52 }
 0x2af   : > { %v1477_v13 = vadd.f32 %v1939_v8, %v1456_v36 }
 0x2b0   : > { %v1497_v19 = vmax.f32 %v1485_v7, %v1486_v10  ;;  %v1478_v12 = vadd.f32 %v1940_v11, %v1460_v60  ;;  %v1351_v14 = vpop.f32.mrb[10].mxu1 }
 0x2b1   : > { %v1489_v20 = vmax.f32 %v1477_v13, 0.0  ;;  %v1941_v15 = vadd.f32 %v1351_v14, %v877_v55  ;;  %v1353_v16 = vpop.f32.mrb[11].mxu1 }
 0x2b2   : > { %v1490_v17 = vmax.f32 %v1478_v12, 0.0  ;;  %v1942_v23 = vadd.f32 %v1353_v16, %v879_v53 }
 0x2b3   : > { %v1481_v24 = vadd.f32 %v1941_v15, %v1456_v36 }
 0x2b4   : > { %v1498_v25 = vmax.f32 %v1489_v20, %v1490_v17  ;;  %v1482_v26 = vadd.f32 %v1942_v23, %v1460_v60 }
 0x2b5   : > { %v1493_v27 = vmax.f32 %v1481_v24, 0.0 }
 0x2b6   : > { %v1494_v41 = vmax.f32 %v1482_v26, 0.0 }
 0x2b8   : > { %v1499_v22 = vmax.f32 %v1493_v27, %v1494_v41 }
 0x2c8   : > { %v1422_v30 = vpop.f32.mrb[0].mxu1 }
 0x2c9   : > { %v1943_v31 = vadd.f32 %v1422_v30, %v782_v46  ;;  %v1424_v40 = vpop.f32.mrb[1].mxu1 }
 0x2ca   : > { %v1944_v61 = vadd.f32 %v1424_v40, %v784_v42 }
 0x2cb   : > { %v1475_v0 = vadd.f32 %v1943_v31, %v1464_v29 }
 0x2cc   : > { %v1476_v32 = vadd.f32 %v1944_v61, %v1468_v35  ;;  %v1428_v33 = vpop.f32.mrb[2].mxu1 }
 0x2cd   : > { %v1487_v34 = vmax.f32 %v1475_v0, 0.0  ;;  %v1945_v37 = vadd.f32 %v1428_v33, %v788_v45  ;;  %v1430_v63 = vpop.f32.mrb[3].mxu1 }
 0x2ce   : > { %v1488_v18 = vmax.f32 %v1476_v32, 0.0  ;;  %v1946_v38 = vadd.f32 %v1430_v63, %v790_v48 }
 0x2cf   : > { %v1500_v43 = vmax.f32 %v1497_v19, %v1487_v34  ;;  %v1479_v44 = vadd.f32 %v1945_v37, %v1464_v29 }
 0x2d0   : > { %v1480_v49 = vadd.f32 %v1946_v38, %v1468_v35  ;;  %v1434_v50 = vpop.f32.mrb[4].mxu1 }
 0x2d1   : > { %v1503_v51 = vmax.f32 %v1500_v43, %v1488_v18  ;;  %v1491_v52 = vmax.f32 %v1479_v44, 0.0  ;;  %v1947_v46 = vadd.f32 %v1434_v50, %v2606_v56  ;;  %v1436_v1 = vpop.f32.mrb[5].mxu1 }
 0x2d2   : > { %v1492_v42 = vmax.f32 %v1480_v49, 0.0  ;;  %v1948_v55 = vadd.f32 %v1436_v1, %v2608_v47 }
 0x2d3   : > { %1506 = vst [vmem:[%s272_s13] sm:$0xff] %v1503_v51  ;;  %v1501_v45 = vmax.f32 %v1498_v25, %v1491_v52  ;;  %v1483_v53 = vadd.f32 %v1947_v46, %v1464_v29 }
 0x2d4   : > { %v1484_v48 = vadd.f32 %v1948_v55, %v1468_v35 }
 0x2d5   : > { %v1504_v54 = vmax.f32 %v1501_v45, %v1492_v42  ;;  %v1495_v57 = vmax.f32 %v1483_v53, 0.0 }
 0x2d6   : > { %v1496_v21 = vmax.f32 %v1484_v48, 0.0 }
 0x2d7   : > { %1507 = vst [vmem:[%s272_s13 + $0x8] sm:$0xff] %v1504_v54  ;;  %v1502_v56 = vmax.f32 %v1499_v22, %v1495_v57 }
 0x2d9   : > { %v1505_v47 = vmax.f32 %v1502_v56, %v1496_v21 }
 0x2db   : > { %1508 = vst [vmem:[%s272_s13 + $0x10] sm:$0xff] %v1505_v47 }
 0x2dc   : > { %2152 = shalt.err (!%p2149_p2)
}
 0x2dd   : > { %s2153_s24 = scalar_lea.hbm %s2622_s14, 384  ;;  %s2157_s11 = scalar_lea.hbm %s2671_s5, 768 }
 0x2de   : > { %p2154_p13 = scmp.ne.s32.totalorder %s2622_s14, %s2153_s24  ;;  %p2158_p4 = scmp.lt.u32.totalorder %s2622_s14, %s2671_s5 }
 0x2df   : > { %p2159_p7 = scmp.lt.u32.totalorder %s2157_s11, %s2153_s24  ;;  %p2161_p11 = scmp.lt.u32.totalorder %s2153_s24, %s2622_s14 }
 0x2e0   : > { %p2155_p6 = pnand %p2154_p13, %p2685_p0 }
 0x2e1   : > { %p2160_p8 = por %p2159_p7, %p2158_p4 }
 0x2e2   : > { %p2156_p10 = pneg %p2155_p6 }
 0x2e3   : > { %p2162_p1 = por %p2161_p11, %p2160_p8 }
 0x2e5   : > { %p2163_p3 = pnand %p2162_p1, %p2156_p10 }
 0x2e7   : > { %2166 = shalt.err (!%p2163_p3)
}
 0x2e8   : > { %s2223_s7 = smov 128   ;;  %s2224_s10 = smov 8  }
 0x2e9   : > { %1986 = dma.vmem_to_hbm [thread:$0]  (%p2685_p0), %s2617_s29, 384, %s2622_s14, %s1510_s15, %s2223_s7, %s2223_s7, %s2224_s10  }
 0x2ea PF: > { %s1538_s28 = sand.u32 1, %s2197_s18   ;;  %p2686_p5 = scmp.ne.s32.totalorder %s2676_s25, 0 }
 0x2eb   : > { %p2687_p9 = scmp.ge.s32.totalorder %s2209_s21, 2  ;;  %s1539_s23 = scalar_lea.sflag [#allocation4], %s1538_s28 }
 0x2ed   : > { %p2000_p12 = pnand %p2687_p9, %p2686_p5 }
 0x2ef   : > { %2192 = dma.done.wait (!%p2000_p12), %s1539_s23, 384  }
 0x2f0   : > { %2194 = vsyncadd (!%p2000_p12), %s1539_s23, 4294966912  ;;  %p19_p2 = scmp.ge.s32.totalorder %s2365_s16, 4   ;;  %s2688_s18 = smov %s2201_s19 }
 0x2f1   : > { %s2689_s19 = smov %s2205_s20  ;;  %s2690_s20 = smov %s2374_s27 }
 0x2f2   : > { %s2691_s21 = smov %s2365_s16  ;;  %21 = sbr.rel (!%p19_p2) target bundleno = 6 (0x6), region = 96 }
 0x2f9   :  { %1544 = vsyncpa [#allocation3], 1 }
 0x2fa   :  { %1546 = vsyncpa [#allocation3 + $0x1], 1 }
 0x2fb   :  { %1547 = vsyncpa [#allocation6], 1 }
 0x2fc   :  { %1548 = vsyncpa [#allocation4], 1 }
 0x2fd   :  { %1550 = vsyncpa [#allocation4 + $0x1], 1 }

</bundles_post_ra>
